<compile_context>
chip_gen: v5e
topology: v5e:2x2
jax: 0.10.0
libtpu: 0.0.40
codegen_flags: <defaults>
</compile_context>

<pallas_src>
import jax
import jax.numpy as jnp
from jax.experimental import pallas as pl
from jax.experimental.pallas import tpu as pltpu


def _round_up(x, m):
    return (x + m - 1) // m * m


def _vitime_kernel(x_ref, rmask_ref, w1_ref, b1_ref, w2_ref, b2_ref, o_ref):
    """One (TILE_M, H) row tile of the fused ViTime forward.

    x_ref     : (TILE_M, H) input rows (original dtype)
    rmask_ref : (TILE_M, 1)  f32 row mask (0 where the W index < size[0], else 1)
    w1/b1     : stage-1 dense stand-in (bf16 / f32), /10 scale pre-folded
    w2/b2     : stage-2 dense stand-in (bf16 / f32), /temperature pre-folded
    """
    x = x_ref[...].astype(jnp.float32)                 # residual copy (xO)

    # TODO(synk): ViTimeAutoencoder (MAE) is not defined in the reference
    # snippet; stand-in is a dense layer along h.  The 1/10 softmax scale is
    # folded into w1/b1 by the wrapper, so no per-element scale here.
    z1 = jnp.dot(x.astype(jnp.bfloat16), w1_ref[...],
                 preferred_element_type=jnp.float32) + b1_ref[...]
    z1 = z1 - jnp.max(z1, axis=-1, keepdims=True)
    e1 = jnp.exp(z1)
    # Intermediate softmax: approx (EUP) reciprocal.  The 20.0 factor, 1/sum
    # and the W-row mask all fuse into one (TILE_M, 1) broadcast scale.
    inv1 = pl.reciprocal(jnp.sum(e1, axis=-1, keepdims=True), approx=True)
    y = e1 * (inv1 * (20.0 * rmask_ref[...])) + x      # 20*softmax*mask + xO

    # TODO(synk): RefiningModel (DeepLab head) is not defined in the reference
    # snippet; stand-in is a second dense layer along h.  The 1/temperature
    # scale is folded into w2/b2 by the wrapper.
    z2 = jnp.dot(y.astype(jnp.bfloat16), w2_ref[...],
                 preferred_element_type=jnp.float32) + b2_ref[...]
    z2 = z2 - jnp.max(z2, axis=-1, keepdims=True)
    e2 = jnp.exp(z2)
    # Output softmax: exact reciprocal so the returned probability rows are
    # normalized (approx is kept only for the intermediate softmax above).
    inv2 = pl.reciprocal(jnp.sum(e2, axis=-1, keepdims=True), approx=False)
    o_ref[...] = (e2 * inv2).astype(o_ref.dtype)
    # NOTE: for large H (MXU-bound regime, H >= ~512) split TILE_M into two
    # unrolled sub-tiles here so one sub-tile's matmul co-issues with the
    # other's softmax (EUP/XLU).  A no-op in the memory-bound small-H regime.


def _pick_tile_m(m, h, vmem_cap):
    """Row-tile size: as big as the generation's VMEM allows, but keep a
    multi-step grid so both v7x TensorCores get work and the pipeline primes."""
    h_lanes = _round_up(h, 128)
    # Rough per-row VMEM cost: (x + out) double-buffered f32 + ~10 full-tile
    # f32/bf16 temporaries inside the body + lane-padded row-mask tile.
    per_row = (2 * 2 + 10) * h_lanes * 4 + 2 * 128 * 4
    cap = int(0.6 * vmem_cap) // per_row
    cap = max(8, min(1024, (cap // 8) * 8))
    # Target >= ~8 grid steps when the problem allows it.
    want = max(8, _round_up(pl.cdiv(m, 8), 8))
    return min(cap, want)


def vitime_forward(x, w1, b1, w2, b2, *, size0, temperature=1.0, tile_m=None):
    """Fused ViTime.forward.  x: (bs, c, w, h); w1/w2: (h, h); b1/b2: (h,)."""
    bs, c, w, h = x.shape
    m = bs * c * w

    try:
        vmem_cap = int(pltpu.get_tpu_info().vmem_capacity_bytes)
    except Exception:
        vmem_cap = 64 * 1024 * 1024   # conservative default = v7x (smallest VMEM)

    if tile_m is None:
        tile_m = _pick_tile_m(m, h, vmem_cap)
    tile_m = max(8, min(int(tile_m), _round_up(m, 8)))
    grid = (pl.cdiv(m, tile_m),)

    # Flatten (bs, c, w, h) -> (bs*c*w, h).  This is a free contiguous
    # reshape; there is NO host-side pad and NO output slice: the blocks use
    # the full (unpadded) h as their last dim and a ragged final row tile is
    # masked by Pallas on store.
    xf = x.reshape(m, h)

    # mask[:, :size[0], :] = 0  ->  W-rows with (flat_row % w) < size0 get 0.
    # Applied only to the 20*softmax term (the residual xO stays unmasked),
    # exactly as in the PyTorch forward.
    rmask = (jnp.arange(m) % w >= int(size0)).astype(jnp.float32).reshape(m, 1)

    # Fold the 1/10 and 1/temperature softmax scales into the weights/biases
    # once; cast weights to bf16 for the MXU (biases stay f32; all softmax /
    # elementwise math stays f32 inside the kernel).
    def prep(wt, bias, scale):
        wt = (wt.astype(jnp.float32) * scale).astype(jnp.bfloat16)
        bias = (bias.astype(jnp.float32) * scale).reshape(1, h)
        return wt, bias

    w1p, b1p = prep(w1, b1, 1.0 / 10.0)
    w2p, b2p = prep(w2, b2, 1.0 / float(temperature))

    # VMEM budget (generation-aware): row tiles double-buffered, weights
    # single-buffered, plus in-kernel temporaries; lane dims rounded to 128
    # because that is how VMEM lays them out even though HBM traffic is not.
    h_lanes = _round_up(h, 128)
    tile_io = tile_m * h_lanes * 4
    est = (2 * 2 * tile_io                        # x + out, double-buffered f32
           + 2 * tile_m * 128 * 4                 # row-mask tile (lane-padded)
           + 2 * _round_up(h, 8) * h_lanes * 2    # two bf16 weights, 1 buffer
           + 2 * 8 * h_lanes * 4                  # two biases
           + 10 * tile_io)                        # in-kernel temporaries
    vmem_limit = int(min(0.75 * vmem_cap, max(32 * 1024 * 1024, 2 * est)))

    cost = pl.CostEstimate(
        flops=int(4 * m * h * h),                 # two (m,h)x(h,h) matmuls
        transcendentals=int(2 * m * h),           # two exps per element
        bytes_accessed=int(2 * m * h * x.dtype.itemsize + m * 4
                           + 2 * h * h * 2 + 2 * h * 4))

    def run(single_buffer_weights):
        if single_buffer_weights:
            # Grid-invariant operands: their index_map is (0, 0) every step,
            # so double-buffering buys nothing; single-buffer to halve VMEM.
            wkw = dict(pipeline_mode=pl.Buffered(1))
        else:
            wkw = {}
        return pl.pallas_call(
            _vitime_kernel,
            out_shape=jax.ShapeDtypeStruct((m, h), x.dtype),
            grid_spec=pltpu.PrefetchScalarGridSpec(
                num_scalar_prefetch=0,
                grid=grid,
                in_specs=[
                    pl.BlockSpec((tile_m, h), lambda i: (i, 0)),     # x rows
                    pl.BlockSpec((tile_m, 1), lambda i: (i, 0)),     # row mask
                    pl.BlockSpec((h, h), lambda i: (0, 0), **wkw),   # W1 (bf16)
                    pl.BlockSpec((1, h), lambda i: (0, 0), **wkw),   # b1
                    pl.BlockSpec((h, h), lambda i: (0, 0), **wkw),   # W2 (bf16)
                    pl.BlockSpec((1, h), lambda i: (0, 0), **wkw),   # b2
                ],
                out_specs=pl.BlockSpec((tile_m, h), lambda i: (i, 0)),
            ),
            compiler_params=pltpu.CompilerParams(
                dimension_semantics=("parallel",),
                vmem_limit_bytes=vmem_limit),
            cost_estimate=cost,
        )(xf, rmask, w1p, b1p, w2p, b2p)

    try:
        out = run(single_buffer_weights=True)
    except Exception:
        # Fallback for Pallas builds where per-BlockSpec buffer counts are not
        # honored in the auto-pipelined path; identical math, default buffers.
        out = run(single_buffer_weights=False)

    return out.reshape(bs, c, w, h)


def _reference_forward(x, w1, b1, w2, b2, *, size0, temperature=1.0):
    """Pure-JAX mirror of the kernel math (bf16 matmul inputs, f32 accum)."""
    bs, c, w, h = x.shape
    xf = x.reshape(bs * c, w, h).astype(jnp.float32)
    w1s = (w1 / 10.0).astype(jnp.bfloat16)
    b1s = b1 / 10.0
    w2s = (w2 / float(temperature)).astype(jnp.bfloat16)
    b2s = b2 / float(temperature)

    z1 = jnp.einsum("nwh,hk->nwk", xf.astype(jnp.bfloat16), w1s,
                    preferred_element_type=jnp.float32) + b1s[None, None, :]
    s1 = jax.nn.softmax(z1, axis=-1)
    mask = (jnp.arange(w) >= int(size0)).astype(jnp.float32)[None, :, None]
    y = 20.0 * s1 * mask + xf
    z2 = jnp.einsum("nwh,hk->nwk", y.astype(jnp.bfloat16), w2s,
                    preferred_element_type=jnp.float32) + b2s[None, None, :]
    out = jax.nn.softmax(z2, axis=-1)
    return out.reshape(bs, c, w, h)


if __name__ == "__main__":
    # Small shapes consistent with ViTime.forward: (bs, c, w, h).
    # w=64, h=24 exercises the multi-step row grid (8 steps), an unpadded
    # (lane<128) last dim, and a row mask spanning several flattened images
    # per tile.
    bs, c, w, h = 2, 4, 64, 24
    size0 = 16          # args.size[0]
    temperature = 1.5

    key = jax.random.PRNGKey(0)
    kx, k1, kb1, k2, kb2 = jax.random.split(key, 5)

    x = jax.random.normal(kx, (bs, c, w, h), dtype=jnp.float32)
    w1 = jax.random.normal(k1, (h, h), dtype=jnp.float32) / jnp.sqrt(h)
    b1 = jax.random.normal(kb1, (h,), dtype=jnp.float32) * 0.01
    w2 = jax.random.normal(k2, (h, h), dtype=jnp.float32) / jnp.sqrt(h)
    b2 = jax.random.normal(kb2, (h,), dtype=jnp.float32) * 0.01

    out = vitime_forward(x, w1, b1, w2, b2,
                         size0=size0, temperature=temperature)
    out = jax.block_until_ready(out)

    ref = _reference_forward(x, w1, b1, w2, b2,
                             size0=size0, temperature=temperature)

    assert out.shape == (bs, c, w, h)
    assert bool(jnp.all(jnp.isfinite(out)))
    # Tolerance covers bf16 matmul inputs + the approx (EUP) reciprocal in the
    # intermediate softmax; a masking/scale bug would be orders larger.
    max_err = float(jnp.max(jnp.abs(out - ref)))
    assert max_err < 1e-2, f"max abs err {max_err}"
    # Output softmax uses an exact reciprocal, so rows sum to 1 tightly.
    rowsum = jnp.sum(out, axis=-1)
    assert bool(jnp.allclose(rowsum, 1.0, atol=1e-3)), "softmax rows not normalized"

    print("KERNEL_OK")
</pallas_src>

<mosaic_0001>
module attributes {stable_mosaic.version = 11 : i64} {
  func.func @_vitime_kernel(%arg0: i32, %arg1: memref<64x24xf32, #tpu.memory_space<vmem>>, %arg2: memref<64x1xf32, #tpu.memory_space<vmem>>, %arg3: memref<24x24xbf16, #tpu.memory_space<vmem>>, %arg4: memref<1x24xf32, #tpu.memory_space<vmem>>, %arg5: memref<24x24xbf16, #tpu.memory_space<vmem>>, %arg6: memref<1x24xf32, #tpu.memory_space<vmem>>, %arg7: memref<64x24xf32, #tpu.memory_space<vmem>>) attributes {dimension_semantics = [#tpu.dimension_semantics<parallel>], iteration_bounds = array<i64: 8>, scalar_prefetch = 0 : i64, scratch_operands = 0 : i64, tpu.core_type = #tpu.core_type<tc>, window_params = [{transform_indices = @transform_0, window_bounds = array<i64: 64, 24>}, {transform_indices = @transform_1, window_bounds = array<i64: 64, 1>}, {pipeline_mode = #tpu.pipeline_mode<synchronous>, transform_indices = @transform_2, window_bounds = array<i64: 24, 24>}, {pipeline_mode = #tpu.pipeline_mode<synchronous>, transform_indices = @transform_3, window_bounds = array<i64: 1, 24>}, {pipeline_mode = #tpu.pipeline_mode<synchronous>, transform_indices = @transform_4, window_bounds = array<i64: 24, 24>}, {pipeline_mode = #tpu.pipeline_mode<synchronous>, transform_indices = @transform_5, window_bounds = array<i64: 1, 24>}, {transform_indices = @transform_6, window_bounds = array<i64: 64, 24>}]} {
    %c0 = arith.constant 0 : index
    %c0_0 = arith.constant 0 : index
    %0 = vector.load %arg1[%c0, %c0_0] : memref<64x24xf32, #tpu.memory_space<vmem>>, vector<64x24xf32>
    %1 = arith.truncf %0 : vector<64x24xf32> to vector<64x24xbf16>
    %c0_1 = arith.constant 0 : index
    %c0_2 = arith.constant 0 : index
    %2 = vector.load %arg3[%c0_1, %c0_2] : memref<24x24xbf16, #tpu.memory_space<vmem>>, vector<24x24xbf16>
    %cst = arith.constant dense<0.000000e+00> : vector<64x24xf32>
    %3 = tpu.matmul %1, %2, %cst {dimension_numbers = #tpu.dot_dimension_numbers<[1], [0], [0], [1], [0, 0, 1, 1], [], []>} : vector<64x24xbf16>, vector<24x24xbf16>, vector<64x24xf32> -> vector<64x24xf32>
    %c0_3 = arith.constant 0 : index
    %c0_4 = arith.constant 0 : index
    %4 = vector.load %arg4[%c0_3, %c0_4] : memref<1x24xf32, #tpu.memory_space<vmem>>, vector<1x24xf32>
    %5 = vector.broadcast %4 : vector<1x24xf32> to vector<64x24xf32>
    %6 = arith.addf %3, %5 : vector<64x24xf32>
    %cst_5 = arith.constant dense<0xFF800000> : vector<64xf32>
    %7 = vector.multi_reduction <maximumf>, %6, %cst_5 [1] : vector<64x24xf32> to vector<64xf32>
    %8 = vector.shape_cast %7 : vector<64xf32> to vector<64x1xf32>
    %9 = vector.broadcast %8 : vector<64x1xf32> to vector<64x24xf32>
    %10 = arith.subf %6, %9 : vector<64x24xf32>
    %11 = math.exp %10 : vector<64x24xf32>
    %cst_6 = arith.constant dense<0.000000e+00> : vector<64xf32>
    %12 = vector.multi_reduction <add>, %11, %cst_6 [1] : vector<64x24xf32> to vector<64xf32>
    %13 = vector.shape_cast %12 : vector<64xf32> to vector<64x1xf32>
    %14 = tpu.reciprocal %13 {approx = true} : vector<64x1xf32> -> vector<64x1xf32>
    %c0_7 = arith.constant 0 : index
    %c0_8 = arith.constant 0 : index
    %15 = vector.load %arg2[%c0_7, %c0_8] : memref<64x1xf32, #tpu.memory_space<vmem>>, vector<64x1xf32>
    %cst_9 = arith.constant 2.000000e+01 : f32
    %16 = vector.broadcast %cst_9 : f32 to vector<64x1xf32>
    %17 = arith.mulf %16, %15 : vector<64x1xf32>
    %18 = arith.mulf %14, %17 : vector<64x1xf32>
    %19 = vector.broadcast %18 : vector<64x1xf32> to vector<64x24xf32>
    %20 = arith.mulf %11, %19 : vector<64x24xf32>
    %21 = arith.addf %20, %0 : vector<64x24xf32>
    %22 = arith.truncf %21 : vector<64x24xf32> to vector<64x24xbf16>
    %c0_10 = arith.constant 0 : index
    %c0_11 = arith.constant 0 : index
    %23 = vector.load %arg5[%c0_10, %c0_11] : memref<24x24xbf16, #tpu.memory_space<vmem>>, vector<24x24xbf16>
    %cst_12 = arith.constant dense<0.000000e+00> : vector<64x24xf32>
    %24 = tpu.matmul %22, %23, %cst_12 {dimension_numbers = #tpu.dot_dimension_numbers<[1], [0], [0], [1], [0, 0, 1, 1], [], []>} : vector<64x24xbf16>, vector<24x24xbf16>, vector<64x24xf32> -> vector<64x24xf32>
    %c0_13 = arith.constant 0 : index
    %c0_14 = arith.constant 0 : index
    %25 = vector.load %arg6[%c0_13, %c0_14] : memref<1x24xf32, #tpu.memory_space<vmem>>, vector<1x24xf32>
    %26 = vector.broadcast %25 : vector<1x24xf32> to vector<64x24xf32>
    %27 = arith.addf %24, %26 : vector<64x24xf32>
    %cst_15 = arith.constant dense<0xFF800000> : vector<64xf32>
    %28 = vector.multi_reduction <maximumf>, %27, %cst_15 [1] : vector<64x24xf32> to vector<64xf32>
    %29 = vector.shape_cast %28 : vector<64xf32> to vector<64x1xf32>
    %30 = vector.broadcast %29 : vector<64x1xf32> to vector<64x24xf32>
    %31 = arith.subf %27, %30 : vector<64x24xf32>
    %32 = math.exp %31 : vector<64x24xf32>
    %cst_16 = arith.constant dense<0.000000e+00> : vector<64xf32>
    %33 = vector.multi_reduction <add>, %32, %cst_16 [1] : vector<64x24xf32> to vector<64xf32>
    %34 = vector.shape_cast %33 : vector<64xf32> to vector<64x1xf32>
    %35 = tpu.reciprocal %34 : vector<64x1xf32> -> vector<64x1xf32>
    %36 = vector.broadcast %35 : vector<64x1xf32> to vector<64x24xf32>
    %37 = arith.mulf %32, %36 : vector<64x24xf32>
    %c0_17 = arith.constant 0 : index
    %c0_18 = arith.constant 0 : index
    %38 = vector.load %arg7[%c0_17, %c0_18] : memref<64x24xf32, #tpu.memory_space<vmem>>, vector<64x24xf32>
    tpu.vector_store %arg7[%c0_17, %c0_18], %37 {strides = array<i32>} : memref<64x24xf32, #tpu.memory_space<vmem>>, vector<64x24xf32>,
    return
  }
  func.func @transform_0(%arg0: i32) -> (i32, i32) {
    %c0_i32 = arith.constant 0 : i32
    %c0_i32_0 = arith.constant 0 : i32
    return %arg0, %c0_i32 : i32, i32
  }
  func.func @transform_1(%arg0: i32) -> (i32, i32) {
    %c0_i32 = arith.constant 0 : i32
    %c0_i32_0 = arith.constant 0 : i32
    return %arg0, %c0_i32 : i32, i32
  }
  func.func @transform_2(%arg0: i32) -> (i32, i32) {
    %c0_i32 = arith.constant 0 : i32
    %c0_i32_0 = arith.constant 0 : i32
    %c0_i32_1 = arith.constant 0 : i32
    return %c0_i32, %c0_i32_0 : i32, i32
  }
  func.func @transform_3(%arg0: i32) -> (i32, i32) {
    %c0_i32 = arith.constant 0 : i32
    %c0_i32_0 = arith.constant 0 : i32
    %c0_i32_1 = arith.constant 0 : i32
    return %c0_i32, %c0_i32_0 : i32, i32
  }
  func.func @transform_4(%arg0: i32) -> (i32, i32) {
    %c0_i32 = arith.constant 0 : i32
    %c0_i32_0 = arith.constant 0 : i32
    %c0_i32_1 = arith.constant 0 : i32
    return %c0_i32, %c0_i32_0 : i32, i32
  }
  func.func @transform_5(%arg0: i32) -> (i32, i32) {
    %c0_i32 = arith.constant 0 : i32
    %c0_i32_0 = arith.constant 0 : i32
    %c0_i32_1 = arith.constant 0 : i32
    return %c0_i32, %c0_i32_0 : i32, i32
  }
  func.func @transform_6(%arg0: i32) -> (i32, i32) {
    %c0_i32 = arith.constant 0 : i32
    %c0_i32_0 = arith.constant 0 : i32
    return %arg0, %c0_i32 : i32, i32
  }
}

module attributes {stable_mosaic.version = 11 : i64} {
  func.func @_vitime_kernel(%arg0: i32, %arg1: memref<64x24xf32, #tpu.memory_space<vmem>>, %arg2: memref<64x1xf32, #tpu.memory_space<vmem>>, %arg3: memref<24x24xbf16, #tpu.memory_space<vmem>>, %arg4: memref<1x24xf32, #tpu.memory_space<vmem>>, %arg5: memref<24x24xbf16, #tpu.memory_space<vmem>>, %arg6: memref<1x24xf32, #tpu.memory_space<vmem>>, %arg7: memref<64x24xf32, #tpu.memory_space<vmem>>) attributes {dimension_semantics = [#tpu.dimension_semantics<parallel>], iteration_bounds = array<i64: 8>, scalar_prefetch = 0 : i64, scratch_operands = 0 : i64, tpu.core_type = #tpu.core_type<tc>, window_params = [{transform_indices = @transform_0, window_bounds = array<i64: 64, 24>}, {transform_indices = @transform_1, window_bounds = array<i64: 64, 1>}, {pipeline_mode = #tpu.pipeline_mode<synchronous>, transform_indices = @transform_2, window_bounds = array<i64: 24, 24>}, {pipeline_mode = #tpu.pipeline_mode<synchronous>, transform_indices = @transform_3, window_bounds = array<i64: 1, 24>}, {pipeline_mode = #tpu.pipeline_mode<synchronous>, transform_indices = @transform_4, window_bounds = array<i64: 24, 24>}, {pipeline_mode = #tpu.pipeline_mode<synchronous>, transform_indices = @transform_5, window_bounds = array<i64: 1, 24>}, {transform_indices = @transform_6, window_bounds = array<i64: 64, 24>}]} {
    %c0 = arith.constant 0 : index
    %c0_0 = arith.constant 0 : index
    %0 = vector.load %arg1[%c0, %c0_0] : memref<64x24xf32, #tpu.memory_space<vmem>>, vector<64x24xf32>
    %1 = arith.truncf %0 : vector<64x24xf32> to vector<64x24xbf16>
    %c0_1 = arith.constant 0 : index
    %c0_2 = arith.constant 0 : index
    %2 = vector.load %arg3[%c0_1, %c0_2] : memref<24x24xbf16, #tpu.memory_space<vmem>>, vector<24x24xbf16>
    %cst = arith.constant dense<0.000000e+00> : vector<64x24xf32>
    %3 = tpu.matmul %1, %2, %cst {dimension_numbers = #tpu.dot_dimension_numbers<[1], [0], [0], [1], [0, 0, 1, 1], [], []>} : vector<64x24xbf16>, vector<24x24xbf16>, vector<64x24xf32> -> vector<64x24xf32>
    %c0_3 = arith.constant 0 : index
    %c0_4 = arith.constant 0 : index
    %4 = vector.load %arg4[%c0_3, %c0_4] : memref<1x24xf32, #tpu.memory_space<vmem>>, vector<1x24xf32>
    %5 = vector.broadcast %4 : vector<1x24xf32> to vector<64x24xf32>
    %6 = arith.addf %3, %5 : vector<64x24xf32>
    %cst_5 = arith.constant dense<0xFF800000> : vector<64xf32>
    %7 = vector.multi_reduction <maximumf>, %6, %cst_5 [1] : vector<64x24xf32> to vector<64xf32>
    %8 = vector.shape_cast %7 : vector<64xf32> to vector<64x1xf32>
    %9 = vector.broadcast %8 : vector<64x1xf32> to vector<64x24xf32>
    %10 = arith.subf %6, %9 : vector<64x24xf32>
    %11 = math.exp %10 : vector<64x24xf32>
    %cst_6 = arith.constant dense<0.000000e+00> : vector<64xf32>
    %12 = vector.multi_reduction <add>, %11, %cst_6 [1] : vector<64x24xf32> to vector<64xf32>
    %13 = vector.shape_cast %12 : vector<64xf32> to vector<64x1xf32>
    %14 = tpu.reciprocal %13 {approx = true} : vector<64x1xf32> -> vector<64x1xf32>
    %c0_7 = arith.constant 0 : index
    %c0_8 = arith.constant 0 : index
    %15 = vector.load %arg2[%c0_7, %c0_8] : memref<64x1xf32, #tpu.memory_space<vmem>>, vector<64x1xf32>
    %cst_9 = arith.constant 2.000000e+01 : f32
    %16 = vector.broadcast %cst_9 : f32 to vector<64x1xf32>
    %17 = arith.mulf %16, %15 : vector<64x1xf32>
    %18 = arith.mulf %14, %17 : vector<64x1xf32>
    %19 = vector.broadcast %18 : vector<64x1xf32> to vector<64x24xf32>
    %20 = arith.mulf %11, %19 : vector<64x24xf32>
    %21 = arith.addf %20, %0 : vector<64x24xf32>
    %22 = arith.truncf %21 : vector<64x24xf32> to vector<64x24xbf16>
    %c0_10 = arith.constant 0 : index
    %c0_11 = arith.constant 0 : index
    %23 = vector.load %arg5[%c0_10, %c0_11] : memref<24x24xbf16, #tpu.memory_space<vmem>>, vector<24x24xbf16>
    %cst_12 = arith.constant dense<0.000000e+00> : vector<64x24xf32>
    %24 = tpu.matmul %22, %23, %cst_12 {dimension_numbers = #tpu.dot_dimension_numbers<[1], [0], [0], [1], [0, 0, 1, 1], [], []>} : vector<64x24xbf16>, vector<24x24xbf16>, vector<64x24xf32> -> vector<64x24xf32>
    %c0_13 = arith.constant 0 : index
    %c0_14 = arith.constant 0 : index
    %25 = vector.load %arg6[%c0_13, %c0_14] : memref<1x24xf32, #tpu.memory_space<vmem>>, vector<1x24xf32>
    %26 = vector.broadcast %25 : vector<1x24xf32> to vector<64x24xf32>
    %27 = arith.addf %24, %26 : vector<64x24xf32>
    %cst_15 = arith.constant dense<0xFF800000> : vector<64xf32>
    %28 = vector.multi_reduction <maximumf>, %27, %cst_15 [1] : vector<64x24xf32> to vector<64xf32>
    %29 = vector.shape_cast %28 : vector<64xf32> to vector<64x1xf32>
    %30 = vector.broadcast %29 : vector<64x1xf32> to vector<64x24xf32>
    %31 = arith.subf %27, %30 : vector<64x24xf32>
    %32 = math.exp %31 : vector<64x24xf32>
    %cst_16 = arith.constant dense<0.000000e+00> : vector<64xf32>
    %33 = vector.multi_reduction <add>, %32, %cst_16 [1] : vector<64x24xf32> to vector<64xf32>
    %34 = vector.shape_cast %33 : vector<64xf32> to vector<64x1xf32>
    %35 = tpu.reciprocal %34 : vector<64x1xf32> -> vector<64x1xf32>
    %36 = vector.broadcast %35 : vector<64x1xf32> to vector<64x24xf32>
    %37 = arith.mulf %32, %36 : vector<64x24xf32>
    %c0_17 = arith.constant 0 : index
    %c0_18 = arith.constant 0 : index
    %38 = vector.load %arg7[%c0_17, %c0_18] : memref<64x24xf32, #tpu.memory_space<vmem>>, vector<64x24xf32>
    tpu.vector_store %arg7[%c0_17, %c0_18], %37 {strides = array<i32>} : memref<64x24xf32, #tpu.memory_space<vmem>>, vector<64x24xf32>,
    return
  }
  func.func @transform_0(%arg0: i32) -> (i32, i32) {
    %c0_i32 = arith.constant 0 : i32
    %c0_i32_0 = arith.constant 0 : i32
    return %arg0, %c0_i32 : i32, i32
  }
  func.func @transform_1(%arg0: i32) -> (i32, i32) {
    %c0_i32 = arith.constant 0 : i32
    %c0_i32_0 = arith.constant 0 : i32
    return %arg0, %c0_i32 : i32, i32
  }
  func.func @transform_2(%arg0: i32) -> (i32, i32) {
    %c0_i32 = arith.constant 0 : i32
    %c0_i32_0 = arith.constant 0 : i32
    %c0_i32_1 = arith.constant 0 : i32
    return %c0_i32, %c0_i32_0 : i32, i32
  }
  func.func @transform_3(%arg0: i32) -> (i32, i32) {
    %c0_i32 = arith.constant 0 : i32
    %c0_i32_0 = arith.constant 0 : i32
    %c0_i32_1 = arith.constant 0 : i32
    return %c0_i32, %c0_i32_0 : i32, i32
  }
  func.func @transform_4(%arg0: i32) -> (i32, i32) {
    %c0_i32 = arith.constant 0 : i32
    %c0_i32_0 = arith.constant 0 : i32
    %c0_i32_1 = arith.constant 0 : i32
    return %c0_i32, %c0_i32_0 : i32, i32
  }
  func.func @transform_5(%arg0: i32) -> (i32, i32) {
    %c0_i32 = arith.constant 0 : i32
    %c0_i32_0 = arith.constant 0 : i32
    %c0_i32_1 = arith.constant 0 : i32
    return %c0_i32, %c0_i32_0 : i32, i32
  }
  func.func @transform_6(%arg0: i32) -> (i32, i32) {
    %c0_i32 = arith.constant 0 : i32
    %c0_i32_0 = arith.constant 0 : i32
    return %arg0, %c0_i32 : i32, i32
  }
}

</mosaic_0001>

<bundles_post_ra>
// kernel: tpu_custom_call.1
= control target key start
LH: loop header
LB: loop body
LE: loop exit
PB: predicated region body
PF: predicated region fallthrough
CT: control target
= control target key end

     0   :  { %s1001_s21 = smov 0   ;;  %s1211_s0 = inlined_call_operand.vmem [shape: f32[512,24], index: 0, kind: input, shape index: {}]   ;;  %s1212_s1 = inlined_call_operand.vmem [shape: f32[512,1], index: 1, kind: input, shape index: {}]   ;;  %s1213_s2 = inlined_call_operand.vmem [shape: bf16[24,24], index: 2, kind: input, shape index: {}]   ;;  %s1214_s3 = inlined_call_operand.vmem [shape: f32[1,24], index: 3, kind: input, shape index: {}]   ;;  %s1215_s4 = inlined_call_operand.vmem [shape: bf16[24,24], index: 4, kind: input, shape index: {}]   ;;  %s1216_s5 = inlined_call_operand.vmem [shape: f32[1,24], index: 5, kind: input, shape index: {}]   ;;  %s1217_s6 = inlined_call_operand.vmem [shape: f32[512,24], index: 6, kind: output, shape index: {}]  }
   0x1 LB: > { %s844_s22 = sadd.s32 4294967295, %s963_s21   ;;  %p848_p0 = scmp.ge.s32.totalorder %s963_s21, 1  ;;  %s963_s21 = sphi %s1001_s21, %s16_s21  }
   0x2   : > { %p224_p1 = scmp.lt.s32.totalorder %s963_s21, 9 }
   0x4   : > { %p225_p2 = pnand %p848_p0, %p224_p1 }
   0x5   : > { %s849_s25 = sshll.u32 (!%p225_p2), %s844_s22, 3 }
   0x6   : > { %228 = sbr.rel (%p225_p2) target bundleno = 967 (0x3c7), region = 44  ;;  %p260_p3 = scmp.lt.s32.totalorder (!%p225_p2), %s849_s25, 63 }
   0xb   : > { %v292_v0 = vld [vmem:[%s1213_s2 + $0x8] sm:$0xf]  ;;  %vm319_vm0 = vcmask 1043456   ;;  %s1219_s25 = smov (!%p260_p3, %s849_s25), 63  ;;  %v873_v4 = vld [vmem:[%s1213_s2] sm:$0xff]  ;;  %vm306_vm1 = vcmask 195584  }
   0xc   : > { %v302_v1 = vunpack.c.l.b16 %v292_v0  ;;  %s1013_s26 = sshll.u32 %s1219_s25, 3  ;;  %v891_v17 = vld [vmem:[%s1214_s3] ss:$0 sm:$0xff] }
   0xd   : > { %s263_s7 = scalar_lea.vmem %s1211_s0, %s1013_s26  ;;  %s1097_s12 = scalar_lea.vmem %s1212_s1, %s1013_s26 }
   0xe   : > { %v304_v2 = vpack.c.b16 %v302_v1, %v302_v1  ;;  %v1022_v5 = vld [vmem:[%s263_s7] sm:$0xff]  ;;  %v1024_v6 = vld [vmem:[%s263_s7 + $0x8] sm:$0xff]  ;;  %v1036_v11 = vld [vmem:[%s263_s7 + $0x10] sm:$0xff]  ;;  %s1181_s22 = scalar_lea.vmem %s1217_s6, %s1013_s26 }
   0xf   : > { %v1026_v7 = vld [vmem:[%s263_s7 + $0x20] sm:$0xff]  ;;  %v1028_v8 = vld [vmem:[%s263_s7 + $0x28] sm:$0xff]  ;;  %v286_v9 = vpack.c.bf16 %v1024_v6, %v1022_v5  ;;  %v1038_v12 = vld [vmem:[%s263_s7 + $0x18] sm:$0xff] }
  0x10   : > { %v321_v3 = vsel %vm319_vm0, %v304_v2, 0  ;;  %v288_v10 = vpack.c.bf16 %v1028_v8, %v1026_v7  ;;  %v1040_v13 = vld [vmem:[%s263_s7 + $0x30] sm:$0xff]  ;;  %v1042_v14 = vld [vmem:[%s263_s7 + $0x38] sm:$0xff]  ;;  %v287_v15 = vpack.c.bf16 %v1038_v12, %v1036_v11 }
  0x11   : > { %329 = vmatpush.bf16.msra.mxu0 %v321_v3  ;;  %875 = vmatpush.bf16.msra.mxu2 %v321_v3  ;;  %v289_v16 = vpack.c.bf16 %v1042_v14, %v1040_v13 }
  0x15   : > { %330 = vmatpush.bf16.msra.mxu0 %v873_v4  ;;  %876 = vmatpush.bf16.msra.mxu2 %v873_v4 }
  0x18   : > { %859 = vmatmul.msk.bf16.vlgmr.msra.gmra.mxu0 %vm306_vm1, %v286_v9  ;;  %861 = vmatmul.msk.bf16.vlgmr.msra.gmra.mxu2 %vm306_vm1, %v288_v10 }
  0x28   : > { %860 = vmatmul.msk.bf16.gmra.mxu0 %vm306_vm1, %v287_v15  ;;  %862 = vmatmul.msk.bf16.gmra.mxu2 %vm306_vm1, %v289_v16 }
  0x95   : > { %v332_v18 = vpop.f32.mrf.mxu0 }
  0x96   : > { %v333_v19 = vadd.f32 %v891_v17, %v332_v18 }
  0x98   : > { %v352_v20 = vsel %vm306_vm1, %v333_v19, -inf }
  0x99   : > { %353 = vmax.xlane.f32.xlu1 %v352_v20 }
  0x9b   : > { %v342_v21 = vpop.f32.mrf.mxu2 }
  0x9c   : > { %v343_v22 = vadd.f32 %v891_v17, %v342_v21 }
  0x9d   : > { %v334_v23 = vpop.f32.mrf.mxu0 }
  0x9e   : > { %v335_v24 = vadd.f32 %v891_v17, %v334_v23  ;;  %v364_v25 = vsel %vm306_vm1, %v343_v22, -inf }
  0x9f   : > { %365 = vmax.xlane.f32.xlu0 %v364_v25 }
  0xa0   : > { %v355_v26 = vsel %vm306_vm1, %v335_v24, -inf }
  0xa1   : > { %356 = vmax.xlane.f32.xlu1 %v355_v26  ;;  %v965_v26 = vmov 0  }
  0xa2   : > { %889 = vset.pattern.permute.xlu0 %v965_v26  ;;  %888 = vset.pattern.permute.xlu1 %v965_v26 }
  0xa3   : > { %v344_v27 = vpop.f32.mrf.mxu2  ;;  %890 = vset.pattern.permute.xlu2 %v965_v26 }
  0xa4   : > { %v345_v28 = vadd.f32 %v891_v17, %v344_v27 }
  0xa5   : > { %v337_v29 = vpop.f32.mrf.mxu0 }
  0xa6   : > { %v367_v30 = vsel %vm306_vm1, %v345_v28, -inf  ;;  %v338_v31 = vadd.f32 %v891_v17, %v337_v29 }
  0xa7   : > { %368 = vmax.xlane.f32.xlu0 %v367_v30 }
  0xa8   : > { %v358_v34 = vsel %vm306_vm1, %v338_v31, -inf }
  0xab   : > { %v347_v32 = vpop.f32.mrf.mxu2 }
  0xac   : > { %v348_v33 = vadd.f32 %v891_v17, %v347_v32  ;;  %v436_v32 = vld [vmem:[%s1097_s12 + $0x20] sm:$0xff] }
  0xad   : > { %v339_v35 = vpop.f32.mrf.mxu0 }
  0xae   : > { %v340_v36 = vadd.f32 %v891_v17, %v339_v35  ;;  %v370_v37 = vsel %vm306_vm1, %v348_v33, -inf }
  0xaf   : > { %371 = vmax.xlane.f32.xlu2 %v370_v37  ;;  %359 = vmax.xlane.f32.xlu0 %v358_v34  ;;  %v444_v34 = vmul.f32 20.0, %v436_v32 }
  0xb0   : > { %v361_v38 = vsel %vm306_vm1, %v340_v36, -inf }
  0xb1   : > { %362 = vmax.xlane.f32.xlu1 %v361_v38  ;;  %v437_v38 = vld [vmem:[%s1097_s12 + $0x28] sm:$0xff] }
  0xb3   : > { %v349_v39 = vpop.f32.mrf.mxu2 }
  0xb4   : > { %v350_v40 = vadd.f32 %v891_v17, %v349_v39 }
  0xb6   : > { %v373_v41 = vsel %vm306_vm1, %v350_v40, -inf }
  0xb7   : > { %374 = vmax.xlane.f32.xlu2 %v373_v41 }
 0x10c   : > { %v354_v42 = vpop.xlane.xlu1 %353 }
 0x10d   : > { %v376_v43 = vsub.f32 %v333_v19, %v354_v42 }
 0x10f   : > { %v384_v44 = vmul.f32 1.442695, %v376_v43 }
 0x111   : > { %893 = vpow2.f32 %v384_v44  ;;  %v438_v44 = vld [vmem:[%s1097_s12 + $0x30] sm:$0xff] }
 0x112   : > { %v366_v45 = vpop.xlane.xlu0 %365 }
 0x113   : > { %v380_v46 = vsub.f32 %v343_v22, %v366_v45  ;;  %v433_v45 = vld [vmem:[%s1097_s12 + $0x8] sm:$0xff] }
 0x114   : > { %v357_v47 = vpop.xlane.xlu1 %356 }
 0x115   : > { %v392_v48 = vmul.f32 1.442695, %v380_v46  ;;  %v377_v49 = vsub.f32 %v335_v24, %v357_v47  ;;  %v446_v47 = vmul.f32 20.0, %v438_v44 }
 0x117   : > { %v1061_v50 = vpop.eup %893  ;;  %895 = vpow2.f32 %v392_v48  ;;  %v386_v52 = vmul.f32 1.442695, %v377_v49  ;;  %v441_v48 = vmul.f32 20.0, %v433_v45 }
 0x118   : > { %v400_v51 = vsel %vm306_vm1, %v1061_v50, 0.0 }
 0x119   : > { %401 = vadd.xlane.f32.xlu1 %v400_v51  ;;  %897 = vpow2.f32 %v386_v52 }
 0x11a   : > { %v369_v53 = vpop.xlane.xlu0 %368 }
 0x11b   : > { %v381_v54 = vsub.f32 %v345_v28, %v369_v53  ;;  %v432_v28 = vld [vmem:[%s1097_s12] sm:$0xff] }
 0x11c   : > { %v440_v29 = vmul.f32 20.0, %v432_v28 }
 0x11d   : > { %v1065_v55 = vpop.eup %895  ;;  %v394_v56 = vmul.f32 1.442695, %v381_v54 }
 0x11e   : > { %v412_v57 = vsel %vm306_vm1, %v1065_v55, 0.0 }
 0x11f   : > { %899 = vpow2.f32 %v394_v56  ;;  %413 = vadd.xlane.f32.xlu2 %v412_v57  ;;  %v1069_v60 = vpop.eup %897  ;;  %v434_v56 = vld [vmem:[%s1097_s12 + $0x10] sm:$0xff]  ;;  %v439_v57 = vld [vmem:[%s1097_s12 + $0x38] sm:$0xff] }
 0x120   : > { %v403_v9 = vsel %vm306_vm1, %v1069_v60, 0.0 }
 0x122   : > { %v372_v58 = vpop.xlane.xlu2 %371  ;;  %v360_v59 = vpop.xlane.xlu0 %359 }
 0x123   : > { %v382_v61 = vsub.f32 %v348_v33, %v372_v58  ;;  %v378_v62 = vsub.f32 %v338_v31, %v360_v59  ;;  %v442_v58 = vmul.f32 20.0, %v434_v56 }
 0x124   : > { %v363_v63 = vpop.xlane.xlu1 %362 }
 0x125   : > { %v1071_v0 = vpop.eup %899  ;;  %v396_v1 = vmul.f32 1.442695, %v382_v61  ;;  %v388_v2 = vmul.f32 1.442695, %v378_v62  ;;  %v379_v3 = vsub.f32 %v340_v36, %v363_v63  ;;  %v447_v62 = vmul.f32 20.0, %v439_v57 }
 0x126   : > { %v415_v4 = vsel %vm306_vm1, %v1071_v0, 0.0 }
 0x127   : > { %901 = vpow2.f32 %v396_v1  ;;  %416 = vadd.xlane.f32.xlu0 %v415_v4  ;;  %404 = vadd.xlane.f32.xlu2 %v403_v9  ;;  %v390_v10 = vmul.f32 1.442695, %v379_v3  ;;  %v435_v3 = vld [vmem:[%s1097_s12 + $0x18] sm:$0xff] }
 0x128   : > { %903 = vpow2.f32 %v388_v2  ;;  %v443_v4 = vmul.f32 20.0, %v435_v3 }
 0x129   : > { %905 = vpow2.f32 %v390_v10 }
 0x12a   : > { %v375_v15 = vpop.xlane.xlu2 %374 }
 0x12b   : > { %v383_v16 = vsub.f32 %v350_v40, %v375_v15  ;;  %v445_v40 = vmul.f32 20.0, %v437_v38  ;;  %v518_v15 = vld [vmem:[%s1215_s4 + $0x8] sm:$0xf] }
 0x12d   : > { %v1077_v17 = vpop.eup %901  ;;  %v398_v18 = vmul.f32 1.442695, %v383_v16  ;;  %v528_v16 = vunpack.c.l.b16 %v518_v15 }
 0x12e   : > { %v1079_v19 = vpop.eup %903  ;;  %v418_v20 = vsel %vm306_vm1, %v1077_v17, 0.0 }
 0x12f   : > { %907 = vpow2.f32 %v398_v18  ;;  %419 = vadd.xlane.f32.xlu0 %v418_v20  ;;  %v406_v21 = vsel %vm306_vm1, %v1079_v19, 0.0  ;;  %v1085_v22 = vpop.eup %905  ;;  %v530_v18 = vpack.c.b16 %v528_v16, %v528_v16 }
 0x130   : > { %407 = vadd.xlane.f32.xlu2 %v406_v21  ;;  %v409_v25 = vsel %vm306_vm1, %v1085_v22, 0.0  ;;  %v874_v21 = vld [vmem:[%s1215_s4] sm:$0xff] }
 0x131   : > { %v545_v20 = vsel %vm319_vm0, %v530_v18, 0 }
 0x132   : > { %553 = vmatpush.bf16.msra.mxu1 %v545_v20  ;;  %877 = vmatpush.bf16.msra.mxu3 %v545_v20 }
 0x135   : > { %v1087_v23 = vpop.eup %907 }
 0x136   : > { %v421_v24 = vsel %vm306_vm1, %v1087_v23, 0.0  ;;  %554 = vmatpush.bf16.msra.mxu1 %v874_v21  ;;  %878 = vmatpush.bf16.msra.mxu3 %v874_v21 }
 0x137   : > { %422 = vadd.xlane.f32.xlu1 %v421_v24  ;;  %410 = vadd.xlane.f32.xlu0 %v409_v25 }
 0x18c   : > { %v402_v27 = vpop.xlane.xlu1 %401 }
 0x18d   : > { %909 = vrcp.f32 %v402_v27 }
 0x192   : > { %v414_v30 = vpop.xlane.xlu2 %413 }
 0x193   : > { %v910_v31 = vpop.eup %909  ;;  %911 = vrcp.f32 %v414_v30 }
 0x194   : > { %v448_v33 = vmul.f32 %v910_v31, %v440_v29 }
 0x196   : > { %458 = vperm.xlu0 %889, %v448_v33  }
 0x199   : > { %v912_v35 = vpop.eup %911 }
 0x19a   : > { %v417_v36 = vpop.xlane.xlu0 %416  ;;  %v452_v37 = vmul.f32 %v912_v35, %v444_v34  ;;  %v405_v39 = vpop.xlane.xlu2 %404 }
 0x19b   : > { %913 = vrcp.f32 %v417_v36 }
 0x19c   : > { %478 = vperm.xlu1 %888, %v452_v37   ;;  %915 = vrcp.f32 %v405_v39 }
 0x1a1   : > { %v914_v41 = vpop.eup %913 }
 0x1a2   : > { %v420_v42 = vpop.xlane.xlu0 %419  ;;  %v453_v43 = vmul.f32 %v914_v41, %v445_v40  ;;  %v916_v49 = vpop.eup %915 }
 0x1a3   : > { %917 = vrcp.f32 %v420_v42  ;;  %v408_v46 = vpop.xlane.xlu2 %407  ;;  %v449_v54 = vmul.f32 %v916_v49, %v441_v48 }
 0x1a4   : > { %483 = vperm.xlu2 %890, %v453_v43   ;;  %919 = vrcp.f32 %v408_v46 }
 0x1a9   : > { %v918_v51 = vpop.eup %917 }
 0x1aa   : > { %v423_v52 = vpop.xlane.xlu1 %422  ;;  %v454_v53 = vmul.f32 %v918_v51, %v446_v47  ;;  %v920_v59 = vpop.eup %919 }
 0x1ab   : > { %921 = vrcp.f32 %v423_v52  ;;  %v411_v61 = vpop.xlane.xlu0 %410  ;;  %v450_v1 = vmul.f32 %v920_v59, %v442_v58 }
 0x1ac   : > { %488 = vperm.xlu1 %888, %v454_v53   ;;  %463 = vperm.xlu2 %890, %v449_v54   ;;  %923 = vrcp.f32 %v411_v61 }
 0x1b1   : > { %v922_v63 = vpop.eup %921 }
 0x1b2   : > { %v455_v2 = vmul.f32 %v922_v63, %v447_v62  ;;  %v924_v9 = vpop.eup %923 }
 0x1b3   : > { %v451_v10 = vmul.f32 %v924_v9, %v443_v4 }
 0x1b4   : > { %468 = vperm.xlu1 %888, %v450_v1   ;;  %493 = vperm.xlu2 %890, %v455_v2  }
 0x1bc   : > { %473 = vperm.xlu2 %890, %v451_v10  }
 0x1fe   : > { %v484_v24 = vpop.permute.xlu2 %483 }
 0x1ff   : > { %v501_v31 = vmul.f32 %v1071_v0, %v484_v24 }
 0x201   : > { %v509_v35 = vadd.f32 %v501_v31, %v1028_v8 }
 0x206   : > { %v464_v25 = vpop.permute.xlu2 %463 }
 0x207   : > { %v497_v26 = vmul.f32 %v1069_v60, %v464_v25 }
 0x208   : > { %v459_v27 = vpop.permute.xlu0 %458 }
 0x209   : > { %v496_v28 = vmul.f32 %v1061_v50, %v459_v27  ;;  %v505_v29 = vadd.f32 %v497_v26, %v1024_v6 }
 0x20b   : > { %v504_v30 = vadd.f32 %v496_v28, %v1022_v5 }
 0x20d   : > { %v512_v32 = vpack.c.bf16 %v505_v29, %v504_v30 }
 0x20e   : > { %v479_v33 = vpop.permute.xlu1 %478  ;;  %v494_v50 = vpop.permute.xlu2 %493 }
 0x20f   : > { %v500_v34 = vmul.f32 %v1065_v55, %v479_v33  ;;  %867 = vmatmul.msk.bf16.vlgmr.msra.gmra.mxu1 %vm306_vm1, %v512_v32  ;;  %v503_v6 = vmul.f32 %v1087_v23, %v494_v50 }
 0x211   : > { %v508_v36 = vadd.f32 %v500_v34, %v1026_v7  ;;  %v511_v0 = vadd.f32 %v503_v6, %v1042_v14 }
 0x213   : > { %v514_v60 = vpack.c.bf16 %v509_v35, %v508_v36 }
 0x215   : > { %869 = vmatmul.msk.bf16.vlgmr.msra.gmra.mxu3 %vm306_vm1, %v514_v60 }
 0x216   : > { %v474_v55 = vpop.permute.xlu2 %473 }
 0x217   : > { %v499_v40 = vmul.f32 %v1085_v22, %v474_v55 }
 0x219   : > { %v507_v41 = vadd.f32 %v499_v40, %v1038_v12 }
 0x21e   : > { %v489_v37 = vpop.permute.xlu1 %488 }
 0x21f   : > { %v502_v5 = vmul.f32 %v1077_v17, %v489_v37 }
 0x221   : > { %v510_v38 = vadd.f32 %v502_v5, %v1040_v13  ;;  %v892_v13 = vld [vmem:[%s1216_s5] ss:$0 sm:$0xff] }
 0x223   : > { %v515_v39 = vpack.c.bf16 %v511_v0, %v510_v38 }
 0x225   : > { %870 = vmatmul.msk.bf16.gmra.mxu3 %vm306_vm1, %v515_v39 }
 0x226   : > { %v469_v7 = vpop.permute.xlu1 %468 }
 0x227   : > { %v498_v8 = vmul.f32 %v1079_v19, %v469_v7 }
 0x229   : > { %v506_v23 = vadd.f32 %v498_v8, %v1036_v11 }
 0x22b   : > { %v513_v42 = vpack.c.bf16 %v507_v41, %v506_v23 }
 0x22d   : > { %868 = vmatmul.msk.bf16.gmra.mxu1 %vm306_vm1, %v513_v42 }
 0x28c   : > { %v556_v14 = vpop.f32.mrf.mxu1 }
 0x28d   : > { %v557_v17 = vadd.f32 %v892_v13, %v556_v14 }
 0x28f   : > { %v576_v22 = vsel %vm306_vm1, %v557_v17, -inf }
 0x290   : > { %577 = vmax.xlane.f32.xlu1 %v576_v22 }
 0x294   : > { %v558_v43 = vpop.f32.mrf.mxu1 }
 0x295   : > { %v559_v44 = vadd.f32 %v892_v13, %v558_v43 }
 0x297   : > { %v579_v19 = vsel %vm306_vm1, %v559_v44, -inf }
 0x298   : > { %580 = vmax.xlane.f32.xlu0 %v579_v19  ;;  %v566_v12 = vpop.f32.mrf.mxu3 }
 0x299   : > { %v567_v45 = vadd.f32 %v892_v13, %v566_v12 }
 0x29b   : > { %v588_v11 = vsel %vm306_vm1, %v567_v45, -inf }
 0x29c   : > { %589 = vmax.xlane.f32.xlu2 %v588_v11 }
 0x2a0   : > { %v568_v46 = vpop.f32.mrf.mxu3 }
 0x2a1   : > { %v569_v47 = vadd.f32 %v892_v13, %v568_v46 }
 0x2a3   : > { %v591_v48 = vsel %vm306_vm1, %v569_v47, -inf }
 0x2a4   : > { %592 = vmax.xlane.f32.xlu0 %v591_v48 }
 0x2a8   : > { %v571_v49 = vpop.f32.mrf.mxu3 }
 0x2a9   : > { %v572_v62 = vadd.f32 %v892_v13, %v571_v49 }
 0x2aa   : > { %v561_v51 = vpop.f32.mrf.mxu1 }
 0x2ab   : > { %v562_v52 = vadd.f32 %v892_v13, %v561_v51  ;;  %v594_v63 = vsel %vm306_vm1, %v572_v62, -inf }
 0x2ad   : > { %v582_v53 = vsel %vm306_vm1, %v562_v52, -inf }
 0x2ae   : > { %583 = vmax.xlane.f32.xlu2 %v582_v53 }
 0x2b0   : > { %v573_v54 = vpop.f32.mrf.mxu3 }
 0x2b1   : > { %v574_v56 = vadd.f32 %v892_v13, %v573_v54 }
 0x2b2   : > { %v563_v57 = vpop.f32.mrf.mxu1 }
 0x2b3   : > { %v564_v58 = vadd.f32 %v892_v13, %v563_v57  ;;  %v597_v61 = vsel %vm306_vm1, %v574_v56, -inf }
 0x2b5   : > { %v585_v59 = vsel %vm306_vm1, %v564_v58, -inf }
 0x2b6   : > { %586 = vmax.xlane.f32.xlu1 %v585_v59  ;;  %598 = vmax.xlane.f32.xlu2 %v597_v61 }
 0x2be   : > { %595 = vmax.xlane.f32.xlu1 %v594_v63 }
 0x303   : > { %v578_v1 = vpop.xlane.xlu1 %577 }
 0x304   : > { %v600_v2 = vsub.f32 %v557_v17, %v578_v1 }
 0x306   : > { %v608_v3 = vmul.f32 1.442695, %v600_v2 }
 0x308   : > { %925 = vpow2.f32 %v608_v3 }
 0x30b   : > { %v581_v4 = vpop.xlane.xlu0 %580 }
 0x30c   : > { %v601_v9 = vsub.f32 %v559_v44, %v581_v4 }
 0x30e   : > { %v1145_v10 = vpop.eup %925  ;;  %v610_v15 = vmul.f32 1.442695, %v601_v9 }
 0x30f   : > { %v590_v16 = vpop.xlane.xlu2 %589  ;;  %v624_v18 = vsel %vm306_vm1, %v1145_v10, 0.0 }
 0x310   : > { %927 = vpow2.f32 %v610_v15  ;;  %v604_v20 = vsub.f32 %v567_v45, %v590_v16  ;;  %625 = vadd.xlane.f32.xlu0 %v624_v18 }
 0x312   : > { %v616_v21 = vmul.f32 1.442695, %v604_v20 }
 0x314   : > { %929 = vpow2.f32 %v616_v21 }
 0x316   : > { %v1149_v24 = vpop.eup %927 }
 0x317   : > { %v627_v25 = vsel %vm306_vm1, %v1149_v24, 0.0  ;;  %v593_v28 = vpop.xlane.xlu0 %592 }
 0x318   : > { %628 = vadd.xlane.f32.xlu1 %v627_v25  ;;  %v605_v31 = vsub.f32 %v569_v47, %v593_v28 }
 0x31a   : > { %v1153_v26 = vpop.eup %929  ;;  %v618_v33 = vmul.f32 1.442695, %v605_v31 }
 0x31b   : > { %v636_v27 = vsel %vm306_vm1, %v1153_v26, 0.0 }
 0x320   : > { %637 = vadd.xlane.f32.xlu1 %v636_v27 }
 0x321   : > { %v584_v29 = vpop.xlane.xlu2 %583 }
 0x322   : > { %v602_v30 = vsub.f32 %v562_v52, %v584_v29 }
 0x324   : > { %v612_v32 = vmul.f32 1.442695, %v602_v30 }
 0x326   : > { %931 = vpow2.f32 %v612_v32 }
 0x327   : > { %933 = vpow2.f32 %v618_v33 }
 0x329   : > { %v599_v34 = vpop.xlane.xlu2 %598  ;;  %v587_v35 = vpop.xlane.xlu1 %586 }
 0x32a   : > { %v607_v36 = vsub.f32 %v574_v56, %v599_v34  ;;  %v603_v60 = vsub.f32 %v564_v58, %v587_v35 }
 0x32c   : > { %v1157_v50 = vpop.eup %931  ;;  %v622_v6 = vmul.f32 1.442695, %v607_v36  ;;  %v614_v37 = vmul.f32 1.442695, %v603_v60 }
 0x32d   : > { %v630_v5 = vsel %vm306_vm1, %v1157_v50, 0.0  ;;  %v1161_v38 = vpop.eup %933 }
 0x32e   : > { %935 = vpow2.f32 %v622_v6  ;;  %631 = vadd.xlane.f32.xlu2 %v630_v5  ;;  %v639_v8 = vsel %vm306_vm1, %v1161_v38, 0.0 }
 0x32f   : > { %937 = vpow2.f32 %v614_v37 }
 0x331   : > { %v596_v0 = vpop.xlane.xlu1 %595 }
 0x332   : > { %v606_v55 = vsub.f32 %v572_v62, %v596_v0 }
 0x334   : > { %v1163_v39 = vpop.eup %935  ;;  %v620_v40 = vmul.f32 1.442695, %v606_v55 }
 0x335   : > { %v1165_v7 = vpop.eup %937  ;;  %v645_v41 = vsel %vm306_vm1, %v1163_v39, 0.0 }
 0x336   : > { %939 = vpow2.f32 %v620_v40  ;;  %640 = vadd.xlane.f32.xlu2 %v639_v8  ;;  %646 = vadd.xlane.f32.xlu1 %v645_v41  ;;  %v633_v23 = vsel %vm306_vm1, %v1165_v7, 0.0 }
 0x337   : > { %634 = vadd.xlane.f32.xlu0 %v633_v23 }
 0x33c   : > { %v1173_v42 = vpop.eup %939 }
 0x33d   : > { %v642_v13 = vsel %vm306_vm1, %v1173_v42, 0.0 }
 0x33f   : > { %643 = vadd.xlane.f32.xlu0 %v642_v13 }
 0x383   : > { %v626_v14 = vpop.xlane.xlu0 %625 }
 0x384   : > { %941 = vrcp.f32 %v626_v14  ;;  %v659_v19 = vand.u32 2147483648, %v626_v14  ;;  %v657_v45 = vand.u32 2147483647, %v626_v14  ;;  %vm653_vm3 = vweird.f32 %v626_v14 }
 0x386   : > { %v660_v47 = vor.u32 1.1754944e-38, %v659_v19  ;;  %vm658_vm5 = vcmp.eq.f32.partialorder %v657_v45, 8.507059e+37 }
 0x38a   : > { %v942_v17 = vpop.eup %941 }
 0x38b   : > { %v649_v22 = vmul.f32 %v942_v17, %v626_v14  ;;  %v629_v43 = vpop.xlane.xlu1 %628  ;;  %vm654_vm2 = vweird.f32 %v942_v17 }
 0x38c   : > { %943 = vrcp.f32 %v629_v43  ;;  %vm655_vm4 = vmor %vm653_vm3, %vm654_vm2  ;;  %v673_v56 = vand.u32 2147483648, %v629_v43  ;;  %v671_v58 = vand.u32 2147483647, %v629_v43  ;;  %vm667_vm7 = vweird.f32 %v629_v43 }
 0x38d   : > { %v650_v44 = vsub.f32 1.0, %v649_v22 }
 0x38e   : > { %v674_v62 = vor.u32 1.1754944e-38, %v673_v56  ;;  %vm672_vm9 = vcmp.eq.f32.partialorder %v671_v58, 8.507059e+37 }
 0x38f   : > { %v651_v12 = vmul.f32 %v942_v17, %v650_v44 }
 0x391   : > { %v652_v11 = vadd.f32 %v942_v17, %v651_v12 }
 0x392   : > { %v944_v46 = vpop.eup %943 }
 0x393   : > { %v656_v48 = vsel %vm655_vm4, %v942_v17, %v652_v11  ;;  %v663_v49 = vmul.f32 %v944_v46, %v629_v43  ;;  %v638_v51 = vpop.xlane.xlu1 %637  ;;  %vm668_vm6 = vweird.f32 %v944_v46 }
 0x394   : > { %v661_v52 = vsel %vm658_vm5, %v660_v47, %v656_v48  ;;  %945 = vrcp.f32 %v638_v51  ;;  %vm669_vm8 = vmor %vm667_vm7, %vm668_vm6  ;;  %v715_v9 = vand.u32 2147483648, %v638_v51  ;;  %v713_v15 = vand.u32 2147483647, %v638_v51 }
 0x395   : > { %v760_v53 = vmul.f32 %v1145_v10, %v661_v52  ;;  %v664_v54 = vsub.f32 1.0, %v663_v49  ;;  %vm709_vm11 = vweird.f32 %v638_v51 }
 0x396   : > { %v716_v20 = vor.u32 1.1754944e-38, %v715_v9  ;;  %vm714_vm13 = vcmp.eq.f32.partialorder %v713_v15, 8.507059e+37 }
 0x397   : > { %768 = vst.msk [vmem:[%s1181_s22] sm:$0xff] %vm306_vm1, %v760_v53  ;;  %v665_v57 = vmul.f32 %v944_v46, %v664_v54 }
 0x399   : > { %v666_v59 = vadd.f32 %v944_v46, %v665_v57 }
 0x39a   : > { %v946_v61 = vpop.eup %945 }
 0x39b   : > { %v670_v63 = vsel %vm669_vm8, %v944_v46, %v666_v59  ;;  %v705_v1 = vmul.f32 %v946_v61, %v638_v51  ;;  %vm710_vm10 = vweird.f32 %v946_v61 }
 0x39c   : > { %v675_v2 = vsel %vm672_vm9, %v674_v62, %v670_v63  ;;  %vm711_vm12 = vmor %vm709_vm11, %vm710_vm10 }
 0x39d   : > { %v761_v3 = vmul.f32 %v1149_v24, %v675_v2  ;;  %v706_v4 = vsub.f32 1.0, %v705_v1 }
 0x39f   : > { %769 = vst.msk [vmem:[%s1181_s22 + $0x8] sm:$0xff] %vm306_vm1, %v761_v3  ;;  %v707_v10 = vmul.f32 %v946_v61, %v706_v4 }
 0x3a1   : > { %v708_v16 = vadd.f32 %v946_v61, %v707_v10  ;;  %v632_v18 = vpop.xlane.xlu2 %631 }
 0x3a2   : > { %947 = vrcp.f32 %v632_v18  ;;  %v687_v33 = vand.u32 2147483648, %v632_v18  ;;  %v685_v35 = vand.u32 2147483647, %v632_v18  ;;  %vm681_vm15 = vweird.f32 %v632_v18 }
 0x3a3   : > { %v712_v21 = vsel %vm711_vm12, %v946_v61, %v708_v16 }
 0x3a4   : > { %v717_v25 = vsel %vm714_vm13, %v716_v20, %v712_v21  ;;  %vm686_vm2 = vcmp.eq.f32.partialorder %v685_v35, 8.507059e+37 }
 0x3a5   : > { %v764_v27 = vmul.f32 %v1153_v26, %v717_v25  ;;  %v688_v26 = vor.u32 1.1754944e-38, %v687_v33 }
 0x3a7   : > { %772 = vst.msk [vmem:[%s1181_s22 + $0x20] sm:$0xff] %vm306_vm1, %v764_v27 }
 0x3a8   : > { %v948_v24 = vpop.eup %947 }
 0x3a9   : > { %v677_v28 = vmul.f32 %v948_v24, %v632_v18  ;;  %v641_v29 = vpop.xlane.xlu2 %640  ;;  %v647_v30 = vpop.xlane.xlu1 %646  ;;  %vm682_vm14 = vweird.f32 %v948_v24 }
 0x3aa   : > { %949 = vrcp.f32 %v641_v29  ;;  %v635_v31 = vpop.xlane.xlu0 %634  ;;  %vm683_vm0 = vmor %vm681_vm15, %vm682_vm14  ;;  %vm723_vm3 = vweird.f32 %v641_v29  ;;  %v727_v13 = vand.u32 2147483647, %v641_v29  ;;  %v729_v17 = vand.u32 2147483648, %v641_v29 }
 0x3ab   : > { %v678_v32 = vsub.f32 1.0, %v677_v28  ;;  %951 = vrcp.f32 %v635_v31  ;;  %v699_v43 = vand.u32 2147483647, %v635_v31  ;;  %v701_v19 = vand.u32 2147483648, %v635_v31 }
 0x3ac   : > { %953 = vrcp.f32 %v647_v30  ;;  %v755_v11 = vand.u32 2147483647, %v647_v30  ;;  %v757_v46 = vand.u32 2147483648, %v647_v30  ;;  %vm695_vm6 = vweird.f32 %v635_v31 }
 0x3ad   : > { %v679_v34 = vmul.f32 %v948_v24, %v678_v32  ;;  %vm728_vm9 = vcmp.eq.f32.partialorder %v727_v13, 8.507059e+37  ;;  %v730_v48 = vor.u32 1.1754944e-38, %v729_v17  ;;  %vm700_vm10 = vcmp.eq.f32.partialorder %v699_v43, 8.507059e+37 }
 0x3ae   : > { %v702_v52 = vor.u32 1.1754944e-38, %v701_v19  ;;  %vm751_vm12 = vweird.f32 %v647_v30  ;;  %vm756_vm14 = vcmp.eq.f32.partialorder %v755_v11, 8.507059e+37  ;;  %v758_v58 = vor.u32 1.1754944e-38, %v757_v46 }
 0x3af   : > { %v680_v36 = vadd.f32 %v948_v24, %v679_v34 }
 0x3b0   : > { %v950_v60 = vpop.eup %949 }
 0x3b1   : > { %v952_v6 = vpop.eup %951  ;;  %v684_v37 = vsel %vm683_vm0, %v948_v24, %v680_v36  ;;  %v719_v5 = vmul.f32 %v950_v60, %v641_v29  ;;  %vm724_vm4 = vweird.f32 %v950_v60 }
 0x3b2   : > { %v954_v0 = vpop.eup %953  ;;  %v689_v55 = vsel %vm686_vm2, %v688_v26, %v684_v37  ;;  %v691_v40 = vmul.f32 %v952_v6, %v635_v31  ;;  %v644_v8 = vpop.xlane.xlu0 %643  ;;  %vm696_vm5 = vweird.f32 %v952_v6  ;;  %vm725_vm8 = vmor %vm723_vm3, %vm724_vm4 }
 0x3b3   : > { %v762_v41 = vmul.f32 %v1157_v50, %v689_v55  ;;  %v720_v23 = vsub.f32 1.0, %v719_v5  ;;  %v747_v14 = vmul.f32 %v954_v0, %v647_v30  ;;  %955 = vrcp.f32 %v644_v8  ;;  %vm697_vm11 = vmor %vm695_vm6, %vm696_vm5 }
 0x3b4   : > { %v692_v22 = vsub.f32 1.0, %v691_v40  ;;  %vm752_vm7 = vweird.f32 %v954_v0  ;;  %v743_v9 = vand.u32 2147483648, %v644_v8  ;;  %vm737_vm0 = vweird.f32 %v644_v8 }
 0x3b5   : > { %770 = vst.msk [vmem:[%s1181_s22 + $0x10] sm:$0xff] %vm306_vm1, %v762_v41  ;;  %v721_v44 = vmul.f32 %v950_v60, %v720_v23  ;;  %v748_v12 = vsub.f32 1.0, %v747_v14  ;;  %vm753_vm13 = vmor %vm751_vm12, %vm752_vm7 }
 0x3b6   : > { %v693_v45 = vmul.f32 %v952_v6, %v692_v22  ;;  %v744_v16 = vor.u32 1.1754944e-38, %v743_v9 }
 0x3b7   : > { %v722_v47 = vadd.f32 %v950_v60, %v721_v44  ;;  %v749_v50 = vmul.f32 %v954_v0, %v748_v12 }
 0x3b8   : > { %v694_v49 = vadd.f32 %v952_v6, %v693_v45 }
 0x3b9   : > { %v726_v51 = vsel %vm725_vm8, %v950_v60, %v722_v47  ;;  %v750_v53 = vadd.f32 %v954_v0, %v749_v50  ;;  %v956_v54 = vpop.eup %955 }
 0x3ba   : > { %v731_v56 = vsel %vm728_vm9, %v730_v48, %v726_v51  ;;  %v698_v57 = vsel %vm697_vm11, %v952_v6, %v694_v49  ;;  %v733_v63 = vmul.f32 %v956_v54, %v644_v8  ;;  %vm738_vm15 = vweird.f32 %v956_v54 }
 0x3bb   : > { %v765_v59 = vmul.f32 %v1161_v38, %v731_v56  ;;  %v703_v61 = vsel %vm700_vm10, %v702_v52, %v698_v57  ;;  %v754_v62 = vsel %vm753_vm13, %v954_v0, %v750_v53  ;;  %v741_v38 = vand.u32 2147483647, %v644_v8  ;;  %vm739_vm2 = vmor %vm737_vm0, %vm738_vm15 }
 0x3bc   : > { %v763_v1 = vmul.f32 %v1165_v7, %v703_v61  ;;  %v759_v2 = vsel %vm756_vm14, %v758_v58, %v754_v62  ;;  %v734_v4 = vsub.f32 1.0, %v733_v63 }
 0x3bd   : > { %773 = vst.msk [vmem:[%s1181_s22 + $0x28] sm:$0xff] %vm306_vm1, %v765_v59  ;;  %v767_v3 = vmul.f32 %v1163_v39, %v759_v2  ;;  %vm742_vm3 = vcmp.eq.f32.partialorder %v741_v38, 8.507059e+37 }
 0x3be   : > { %771 = vst.msk [vmem:[%s1181_s22 + $0x18] sm:$0xff] %vm306_vm1, %v763_v1  ;;  %v735_v10 = vmul.f32 %v956_v54, %v734_v4 }
 0x3bf   : > { %775 = vst.msk [vmem:[%s1181_s22 + $0x38] sm:$0xff] %vm306_vm1, %v767_v3 }
 0x3c0   : > { %v736_v15 = vadd.f32 %v956_v54, %v735_v10 }
 0x3c2   : > { %v740_v7 = vsel %vm739_vm2, %v956_v54, %v736_v15 }
 0x3c3   : > { %v745_v18 = vsel %vm742_vm3, %v744_v16, %v740_v7 }
 0x3c4   : > { %v766_v20 = vmul.f32 %v1173_v42, %v745_v18 }
 0x3c6   : > { %774 = vst.msk [vmem:[%s1181_s22 + $0x30] sm:$0xff] %vm306_vm1, %v766_v20 }
 0x3c7 PF: > { %s16_s21 = sadd.s32 1, %s963_s21  }
 0x3c8   : > { %p13_p4 = scmp.ge.s32.totalorder %s16_s21, 10  }
 0x3ca   :  { %15 = sbr.rel (!%p13_p4) target bundleno = 1 (0x1), region = 77 }

// kernel: tpu_custom_call.1
= control target key start
LH: loop header
LB: loop body
LE: loop exit
PB: predicated region body
PF: predicated region fallthrough
CT: control target
= control target key end

     0   :  { %s1001_s21 = smov 0   ;;  %s1211_s0 = inlined_call_operand.vmem [shape: f32[512,24], index: 0, kind: input, shape index: {}]   ;;  %s1212_s1 = inlined_call_operand.vmem [shape: f32[512,1], index: 1, kind: input, shape index: {}]   ;;  %s1213_s2 = inlined_call_operand.vmem [shape: bf16[24,24], index: 2, kind: input, shape index: {}]   ;;  %s1214_s3 = inlined_call_operand.vmem [shape: f32[1,24], index: 3, kind: input, shape index: {}]   ;;  %s1215_s4 = inlined_call_operand.vmem [shape: bf16[24,24], index: 4, kind: input, shape index: {}]   ;;  %s1216_s5 = inlined_call_operand.vmem [shape: f32[1,24], index: 5, kind: input, shape index: {}]   ;;  %s1217_s6 = inlined_call_operand.vmem [shape: f32[512,24], index: 6, kind: output, shape index: {}]  }
   0x1 LB: > { %s844_s22 = sadd.s32 4294967295, %s963_s21   ;;  %p848_p0 = scmp.ge.s32.totalorder %s963_s21, 1  ;;  %s963_s21 = sphi %s1001_s21, %s16_s21  }
   0x2   : > { %p224_p1 = scmp.lt.s32.totalorder %s963_s21, 9 }
   0x4   : > { %p225_p2 = pnand %p848_p0, %p224_p1 }
   0x5   : > { %s849_s25 = sshll.u32 (!%p225_p2), %s844_s22, 3 }
   0x6   : > { %228 = sbr.rel (%p225_p2) target bundleno = 967 (0x3c7), region = 44  ;;  %p260_p3 = scmp.lt.s32.totalorder (!%p225_p2), %s849_s25, 63 }
   0xb   : > { %v292_v0 = vld [vmem:[%s1213_s2 + $0x8] sm:$0xf]  ;;  %vm319_vm0 = vcmask 1043456   ;;  %s1219_s25 = smov (!%p260_p3, %s849_s25), 63  ;;  %v873_v4 = vld [vmem:[%s1213_s2] sm:$0xff]  ;;  %vm306_vm1 = vcmask 195584  }
   0xc   : > { %v302_v1 = vunpack.c.l.b16 %v292_v0  ;;  %s1013_s26 = sshll.u32 %s1219_s25, 3  ;;  %v891_v17 = vld [vmem:[%s1214_s3] ss:$0 sm:$0xff] }
   0xd   : > { %s263_s7 = scalar_lea.vmem %s1211_s0, %s1013_s26  ;;  %s1097_s12 = scalar_lea.vmem %s1212_s1, %s1013_s26 }
   0xe   : > { %v304_v2 = vpack.c.b16 %v302_v1, %v302_v1  ;;  %v1022_v5 = vld [vmem:[%s263_s7] sm:$0xff]  ;;  %v1024_v6 = vld [vmem:[%s263_s7 + $0x8] sm:$0xff]  ;;  %v1036_v11 = vld [vmem:[%s263_s7 + $0x10] sm:$0xff]  ;;  %s1181_s22 = scalar_lea.vmem %s1217_s6, %s1013_s26 }
   0xf   : > { %v1026_v7 = vld [vmem:[%s263_s7 + $0x20] sm:$0xff]  ;;  %v1028_v8 = vld [vmem:[%s263_s7 + $0x28] sm:$0xff]  ;;  %v286_v9 = vpack.c.bf16 %v1024_v6, %v1022_v5  ;;  %v1038_v12 = vld [vmem:[%s263_s7 + $0x18] sm:$0xff] }
  0x10   : > { %v321_v3 = vsel %vm319_vm0, %v304_v2, 0  ;;  %v288_v10 = vpack.c.bf16 %v1028_v8, %v1026_v7  ;;  %v1040_v13 = vld [vmem:[%s263_s7 + $0x30] sm:$0xff]  ;;  %v1042_v14 = vld [vmem:[%s263_s7 + $0x38] sm:$0xff]  ;;  %v287_v15 = vpack.c.bf16 %v1038_v12, %v1036_v11 }
  0x11   : > { %329 = vmatpush.bf16.msra.mxu0 %v321_v3  ;;  %875 = vmatpush.bf16.msra.mxu2 %v321_v3  ;;  %v289_v16 = vpack.c.bf16 %v1042_v14, %v1040_v13 }
  0x15   : > { %330 = vmatpush.bf16.msra.mxu0 %v873_v4  ;;  %876 = vmatpush.bf16.msra.mxu2 %v873_v4 }
  0x18   : > { %859 = vmatmul.msk.bf16.vlgmr.msra.gmra.mxu0 %vm306_vm1, %v286_v9  ;;  %861 = vmatmul.msk.bf16.vlgmr.msra.gmra.mxu2 %vm306_vm1, %v288_v10 }
  0x28   : > { %860 = vmatmul.msk.bf16.gmra.mxu0 %vm306_vm1, %v287_v15  ;;  %862 = vmatmul.msk.bf16.gmra.mxu2 %vm306_vm1, %v289_v16 }
  0x95   : > { %v332_v18 = vpop.f32.mrf.mxu0 }
  0x96   : > { %v333_v19 = vadd.f32 %v891_v17, %v332_v18 }
  0x98   : > { %v352_v20 = vsel %vm306_vm1, %v333_v19, -inf }
  0x99   : > { %353 = vmax.xlane.f32.xlu1 %v352_v20 }
  0x9b   : > { %v342_v21 = vpop.f32.mrf.mxu2 }
  0x9c   : > { %v343_v22 = vadd.f32 %v891_v17, %v342_v21 }
  0x9d   : > { %v334_v23 = vpop.f32.mrf.mxu0 }
  0x9e   : > { %v335_v24 = vadd.f32 %v891_v17, %v334_v23  ;;  %v364_v25 = vsel %vm306_vm1, %v343_v22, -inf }
  0x9f   : > { %365 = vmax.xlane.f32.xlu0 %v364_v25 }
  0xa0   : > { %v355_v26 = vsel %vm306_vm1, %v335_v24, -inf }
  0xa1   : > { %356 = vmax.xlane.f32.xlu1 %v355_v26  ;;  %v965_v26 = vmov 0  }
  0xa2   : > { %889 = vset.pattern.permute.xlu0 %v965_v26  ;;  %888 = vset.pattern.permute.xlu1 %v965_v26 }
  0xa3   : > { %v344_v27 = vpop.f32.mrf.mxu2  ;;  %890 = vset.pattern.permute.xlu2 %v965_v26 }
  0xa4   : > { %v345_v28 = vadd.f32 %v891_v17, %v344_v27 }
  0xa5   : > { %v337_v29 = vpop.f32.mrf.mxu0 }
  0xa6   : > { %v367_v30 = vsel %vm306_vm1, %v345_v28, -inf  ;;  %v338_v31 = vadd.f32 %v891_v17, %v337_v29 }
  0xa7   : > { %368 = vmax.xlane.f32.xlu0 %v367_v30 }
  0xa8   : > { %v358_v34 = vsel %vm306_vm1, %v338_v31, -inf }
  0xab   : > { %v347_v32 = vpop.f32.mrf.mxu2 }
  0xac   : > { %v348_v33 = vadd.f32 %v891_v17, %v347_v32  ;;  %v436_v32 = vld [vmem:[%s1097_s12 + $0x20] sm:$0xff] }
  0xad   : > { %v339_v35 = vpop.f32.mrf.mxu0 }
  0xae   : > { %v340_v36 = vadd.f32 %v891_v17, %v339_v35  ;;  %v370_v37 = vsel %vm306_vm1, %v348_v33, -inf }
  0xaf   : > { %371 = vmax.xlane.f32.xlu2 %v370_v37  ;;  %359 = vmax.xlane.f32.xlu0 %v358_v34  ;;  %v444_v34 = vmul.f32 20.0, %v436_v32 }
  0xb0   : > { %v361_v38 = vsel %vm306_vm1, %v340_v36, -inf }
  0xb1   : > { %362 = vmax.xlane.f32.xlu1 %v361_v38  ;;  %v437_v38 = vld [vmem:[%s1097_s12 + $0x28] sm:$0xff] }
  0xb3   : > { %v349_v39 = vpop.f32.mrf.mxu2 }
  0xb4   : > { %v350_v40 = vadd.f32 %v891_v17, %v349_v39 }
  0xb6   : > { %v373_v41 = vsel %vm306_vm1, %v350_v40, -inf }
  0xb7   : > { %374 = vmax.xlane.f32.xlu2 %v373_v41 }
 0x10c   : > { %v354_v42 = vpop.xlane.xlu1 %353 }
 0x10d   : > { %v376_v43 = vsub.f32 %v333_v19, %v354_v42 }
 0x10f   : > { %v384_v44 = vmul.f32 1.442695, %v376_v43 }
 0x111   : > { %893 = vpow2.f32 %v384_v44  ;;  %v438_v44 = vld [vmem:[%s1097_s12 + $0x30] sm:$0xff] }
 0x112   : > { %v366_v45 = vpop.xlane.xlu0 %365 }
 0x113   : > { %v380_v46 = vsub.f32 %v343_v22, %v366_v45  ;;  %v433_v45 = vld [vmem:[%s1097_s12 + $0x8] sm:$0xff] }
 0x114   : > { %v357_v47 = vpop.xlane.xlu1 %356 }
 0x115   : > { %v392_v48 = vmul.f32 1.442695, %v380_v46  ;;  %v377_v49 = vsub.f32 %v335_v24, %v357_v47  ;;  %v446_v47 = vmul.f32 20.0, %v438_v44 }
 0x117   : > { %v1061_v50 = vpop.eup %893  ;;  %895 = vpow2.f32 %v392_v48  ;;  %v386_v52 = vmul.f32 1.442695, %v377_v49  ;;  %v441_v48 = vmul.f32 20.0, %v433_v45 }
 0x118   : > { %v400_v51 = vsel %vm306_vm1, %v1061_v50, 0.0 }
 0x119   : > { %401 = vadd.xlane.f32.xlu1 %v400_v51  ;;  %897 = vpow2.f32 %v386_v52 }
 0x11a   : > { %v369_v53 = vpop.xlane.xlu0 %368 }
 0x11b   : > { %v381_v54 = vsub.f32 %v345_v28, %v369_v53  ;;  %v432_v28 = vld [vmem:[%s1097_s12] sm:$0xff] }
 0x11c   : > { %v440_v29 = vmul.f32 20.0, %v432_v28 }
 0x11d   : > { %v1065_v55 = vpop.eup %895  ;;  %v394_v56 = vmul.f32 1.442695, %v381_v54 }
 0x11e   : > { %v412_v57 = vsel %vm306_vm1, %v1065_v55, 0.0 }
 0x11f   : > { %899 = vpow2.f32 %v394_v56  ;;  %413 = vadd.xlane.f32.xlu2 %v412_v57  ;;  %v1069_v60 = vpop.eup %897  ;;  %v434_v56 = vld [vmem:[%s1097_s12 + $0x10] sm:$0xff]  ;;  %v439_v57 = vld [vmem:[%s1097_s12 + $0x38] sm:$0xff] }
 0x120   : > { %v403_v9 = vsel %vm306_vm1, %v1069_v60, 0.0 }
 0x122   : > { %v372_v58 = vpop.xlane.xlu2 %371  ;;  %v360_v59 = vpop.xlane.xlu0 %359 }
 0x123   : > { %v382_v61 = vsub.f32 %v348_v33, %v372_v58  ;;  %v378_v62 = vsub.f32 %v338_v31, %v360_v59  ;;  %v442_v58 = vmul.f32 20.0, %v434_v56 }
 0x124   : > { %v363_v63 = vpop.xlane.xlu1 %362 }
 0x125   : > { %v1071_v0 = vpop.eup %899  ;;  %v396_v1 = vmul.f32 1.442695, %v382_v61  ;;  %v388_v2 = vmul.f32 1.442695, %v378_v62  ;;  %v379_v3 = vsub.f32 %v340_v36, %v363_v63  ;;  %v447_v62 = vmul.f32 20.0, %v439_v57 }
 0x126   : > { %v415_v4 = vsel %vm306_vm1, %v1071_v0, 0.0 }
 0x127   : > { %901 = vpow2.f32 %v396_v1  ;;  %416 = vadd.xlane.f32.xlu0 %v415_v4  ;;  %404 = vadd.xlane.f32.xlu2 %v403_v9  ;;  %v390_v10 = vmul.f32 1.442695, %v379_v3  ;;  %v435_v3 = vld [vmem:[%s1097_s12 + $0x18] sm:$0xff] }
 0x128   : > { %903 = vpow2.f32 %v388_v2  ;;  %v443_v4 = vmul.f32 20.0, %v435_v3 }
 0x129   : > { %905 = vpow2.f32 %v390_v10 }
 0x12a   : > { %v375_v15 = vpop.xlane.xlu2 %374 }
 0x12b   : > { %v383_v16 = vsub.f32 %v350_v40, %v375_v15  ;;  %v445_v40 = vmul.f32 20.0, %v437_v38  ;;  %v518_v15 = vld [vmem:[%s1215_s4 + $0x8] sm:$0xf] }
 0x12d   : > { %v1077_v17 = vpop.eup %901  ;;  %v398_v18 = vmul.f32 1.442695, %v383_v16  ;;  %v528_v16 = vunpack.c.l.b16 %v518_v15 }
 0x12e   : > { %v1079_v19 = vpop.eup %903  ;;  %v418_v20 = vsel %vm306_vm1, %v1077_v17, 0.0 }
 0x12f   : > { %907 = vpow2.f32 %v398_v18  ;;  %419 = vadd.xlane.f32.xlu0 %v418_v20  ;;  %v406_v21 = vsel %vm306_vm1, %v1079_v19, 0.0  ;;  %v1085_v22 = vpop.eup %905  ;;  %v530_v18 = vpack.c.b16 %v528_v16, %v528_v16 }
 0x130   : > { %407 = vadd.xlane.f32.xlu2 %v406_v21  ;;  %v409_v25 = vsel %vm306_vm1, %v1085_v22, 0.0  ;;  %v874_v21 = vld [vmem:[%s1215_s4] sm:$0xff] }
 0x131   : > { %v545_v20 = vsel %vm319_vm0, %v530_v18, 0 }
 0x132   : > { %553 = vmatpush.bf16.msra.mxu1 %v545_v20  ;;  %877 = vmatpush.bf16.msra.mxu3 %v545_v20 }
 0x135   : > { %v1087_v23 = vpop.eup %907 }
 0x136   : > { %v421_v24 = vsel %vm306_vm1, %v1087_v23, 0.0  ;;  %554 = vmatpush.bf16.msra.mxu1 %v874_v21  ;;  %878 = vmatpush.bf16.msra.mxu3 %v874_v21 }
 0x137   : > { %422 = vadd.xlane.f32.xlu1 %v421_v24  ;;  %410 = vadd.xlane.f32.xlu0 %v409_v25 }
 0x18c   : > { %v402_v27 = vpop.xlane.xlu1 %401 }
 0x18d   : > { %909 = vrcp.f32 %v402_v27 }
 0x192   : > { %v414_v30 = vpop.xlane.xlu2 %413 }
 0x193   : > { %v910_v31 = vpop.eup %909  ;;  %911 = vrcp.f32 %v414_v30 }
 0x194   : > { %v448_v33 = vmul.f32 %v910_v31, %v440_v29 }
 0x196   : > { %458 = vperm.xlu0 %889, %v448_v33  }
 0x199   : > { %v912_v35 = vpop.eup %911 }
 0x19a   : > { %v417_v36 = vpop.xlane.xlu0 %416  ;;  %v452_v37 = vmul.f32 %v912_v35, %v444_v34  ;;  %v405_v39 = vpop.xlane.xlu2 %404 }
 0x19b   : > { %913 = vrcp.f32 %v417_v36 }
 0x19c   : > { %478 = vperm.xlu1 %888, %v452_v37   ;;  %915 = vrcp.f32 %v405_v39 }
 0x1a1   : > { %v914_v41 = vpop.eup %913 }
 0x1a2   : > { %v420_v42 = vpop.xlane.xlu0 %419  ;;  %v453_v43 = vmul.f32 %v914_v41, %v445_v40  ;;  %v916_v49 = vpop.eup %915 }
 0x1a3   : > { %917 = vrcp.f32 %v420_v42  ;;  %v408_v46 = vpop.xlane.xlu2 %407  ;;  %v449_v54 = vmul.f32 %v916_v49, %v441_v48 }
 0x1a4   : > { %483 = vperm.xlu2 %890, %v453_v43   ;;  %919 = vrcp.f32 %v408_v46 }
 0x1a9   : > { %v918_v51 = vpop.eup %917 }
 0x1aa   : > { %v423_v52 = vpop.xlane.xlu1 %422  ;;  %v454_v53 = vmul.f32 %v918_v51, %v446_v47  ;;  %v920_v59 = vpop.eup %919 }
 0x1ab   : > { %921 = vrcp.f32 %v423_v52  ;;  %v411_v61 = vpop.xlane.xlu0 %410  ;;  %v450_v1 = vmul.f32 %v920_v59, %v442_v58 }
 0x1ac   : > { %488 = vperm.xlu1 %888, %v454_v53   ;;  %463 = vperm.xlu2 %890, %v449_v54   ;;  %923 = vrcp.f32 %v411_v61 }
 0x1b1   : > { %v922_v63 = vpop.eup %921 }
 0x1b2   : > { %v455_v2 = vmul.f32 %v922_v63, %v447_v62  ;;  %v924_v9 = vpop.eup %923 }
 0x1b3   : > { %v451_v10 = vmul.f32 %v924_v9, %v443_v4 }
 0x1b4   : > { %468 = vperm.xlu1 %888, %v450_v1   ;;  %493 = vperm.xlu2 %890, %v455_v2  }
 0x1bc   : > { %473 = vperm.xlu2 %890, %v451_v10  }
 0x1fe   : > { %v484_v24 = vpop.permute.xlu2 %483 }
 0x1ff   : > { %v501_v31 = vmul.f32 %v1071_v0, %v484_v24 }
 0x201   : > { %v509_v35 = vadd.f32 %v501_v31, %v1028_v8 }
 0x206   : > { %v464_v25 = vpop.permute.xlu2 %463 }
 0x207   : > { %v497_v26 = vmul.f32 %v1069_v60, %v464_v25 }
 0x208   : > { %v459_v27 = vpop.permute.xlu0 %458 }
 0x209   : > { %v496_v28 = vmul.f32 %v1061_v50, %v459_v27  ;;  %v505_v29 = vadd.f32 %v497_v26, %v1024_v6 }
 0x20b   : > { %v504_v30 = vadd.f32 %v496_v28, %v1022_v5 }
 0x20d   : > { %v512_v32 = vpack.c.bf16 %v505_v29, %v504_v30 }
 0x20e   : > { %v479_v33 = vpop.permute.xlu1 %478  ;;  %v494_v50 = vpop.permute.xlu2 %493 }
 0x20f   : > { %v500_v34 = vmul.f32 %v1065_v55, %v479_v33  ;;  %867 = vmatmul.msk.bf16.vlgmr.msra.gmra.mxu1 %vm306_vm1, %v512_v32  ;;  %v503_v6 = vmul.f32 %v1087_v23, %v494_v50 }
 0x211   : > { %v508_v36 = vadd.f32 %v500_v34, %v1026_v7  ;;  %v511_v0 = vadd.f32 %v503_v6, %v1042_v14 }
 0x213   : > { %v514_v60 = vpack.c.bf16 %v509_v35, %v508_v36 }
 0x215   : > { %869 = vmatmul.msk.bf16.vlgmr.msra.gmra.mxu3 %vm306_vm1, %v514_v60 }
 0x216   : > { %v474_v55 = vpop.permute.xlu2 %473 }
 0x217   : > { %v499_v40 = vmul.f32 %v1085_v22, %v474_v55 }
 0x219   : > { %v507_v41 = vadd.f32 %v499_v40, %v1038_v12 }
 0x21e   : > { %v489_v37 = vpop.permute.xlu1 %488 }
 0x21f   : > { %v502_v5 = vmul.f32 %v1077_v17, %v489_v37 }
 0x221   : > { %v510_v38 = vadd.f32 %v502_v5, %v1040_v13  ;;  %v892_v13 = vld [vmem:[%s1216_s5] ss:$0 sm:$0xff] }
 0x223   : > { %v515_v39 = vpack.c.bf16 %v511_v0, %v510_v38 }
 0x225   : > { %870 = vmatmul.msk.bf16.gmra.mxu3 %vm306_vm1, %v515_v39 }
 0x226   : > { %v469_v7 = vpop.permute.xlu1 %468 }
 0x227   : > { %v498_v8 = vmul.f32 %v1079_v19, %v469_v7 }
 0x229   : > { %v506_v23 = vadd.f32 %v498_v8, %v1036_v11 }
 0x22b   : > { %v513_v42 = vpack.c.bf16 %v507_v41, %v506_v23 }
 0x22d   : > { %868 = vmatmul.msk.bf16.gmra.mxu1 %vm306_vm1, %v513_v42 }
 0x28c   : > { %v556_v14 = vpop.f32.mrf.mxu1 }
 0x28d   : > { %v557_v17 = vadd.f32 %v892_v13, %v556_v14 }
 0x28f   : > { %v576_v22 = vsel %vm306_vm1, %v557_v17, -inf }
 0x290   : > { %577 = vmax.xlane.f32.xlu1 %v576_v22 }
 0x294   : > { %v558_v43 = vpop.f32.mrf.mxu1 }
 0x295   : > { %v559_v44 = vadd.f32 %v892_v13, %v558_v43 }
 0x297   : > { %v579_v19 = vsel %vm306_vm1, %v559_v44, -inf }
 0x298   : > { %580 = vmax.xlane.f32.xlu0 %v579_v19  ;;  %v566_v12 = vpop.f32.mrf.mxu3 }
 0x299   : > { %v567_v45 = vadd.f32 %v892_v13, %v566_v12 }
 0x29b   : > { %v588_v11 = vsel %vm306_vm1, %v567_v45, -inf }
 0x29c   : > { %589 = vmax.xlane.f32.xlu2 %v588_v11 }
 0x2a0   : > { %v568_v46 = vpop.f32.mrf.mxu3 }
 0x2a1   : > { %v569_v47 = vadd.f32 %v892_v13, %v568_v46 }
 0x2a3   : > { %v591_v48 = vsel %vm306_vm1, %v569_v47, -inf }
 0x2a4   : > { %592 = vmax.xlane.f32.xlu0 %v591_v48 }
 0x2a8   : > { %v571_v49 = vpop.f32.mrf.mxu3 }
 0x2a9   : > { %v572_v62 = vadd.f32 %v892_v13, %v571_v49 }
 0x2aa   : > { %v561_v51 = vpop.f32.mrf.mxu1 }
 0x2ab   : > { %v562_v52 = vadd.f32 %v892_v13, %v561_v51  ;;  %v594_v63 = vsel %vm306_vm1, %v572_v62, -inf }
 0x2ad   : > { %v582_v53 = vsel %vm306_vm1, %v562_v52, -inf }
 0x2ae   : > { %583 = vmax.xlane.f32.xlu2 %v582_v53 }
 0x2b0   : > { %v573_v54 = vpop.f32.mrf.mxu3 }
 0x2b1   : > { %v574_v56 = vadd.f32 %v892_v13, %v573_v54 }
 0x2b2   : > { %v563_v57 = vpop.f32.mrf.mxu1 }
 0x2b3   : > { %v564_v58 = vadd.f32 %v892_v13, %v563_v57  ;;  %v597_v61 = vsel %vm306_vm1, %v574_v56, -inf }
 0x2b5   : > { %v585_v59 = vsel %vm306_vm1, %v564_v58, -inf }
 0x2b6   : > { %586 = vmax.xlane.f32.xlu1 %v585_v59  ;;  %598 = vmax.xlane.f32.xlu2 %v597_v61 }
 0x2be   : > { %595 = vmax.xlane.f32.xlu1 %v594_v63 }
 0x303   : > { %v578_v1 = vpop.xlane.xlu1 %577 }
 0x304   : > { %v600_v2 = vsub.f32 %v557_v17, %v578_v1 }
 0x306   : > { %v608_v3 = vmul.f32 1.442695, %v600_v2 }
 0x308   : > { %925 = vpow2.f32 %v608_v3 }
 0x30b   : > { %v581_v4 = vpop.xlane.xlu0 %580 }
 0x30c   : > { %v601_v9 = vsub.f32 %v559_v44, %v581_v4 }
 0x30e   : > { %v1145_v10 = vpop.eup %925  ;;  %v610_v15 = vmul.f32 1.442695, %v601_v9 }
 0x30f   : > { %v590_v16 = vpop.xlane.xlu2 %589  ;;  %v624_v18 = vsel %vm306_vm1, %v1145_v10, 0.0 }
 0x310   : > { %927 = vpow2.f32 %v610_v15  ;;  %v604_v20 = vsub.f32 %v567_v45, %v590_v16  ;;  %625 = vadd.xlane.f32.xlu0 %v624_v18 }
 0x312   : > { %v616_v21 = vmul.f32 1.442695, %v604_v20 }
 0x314   : > { %929 = vpow2.f32 %v616_v21 }
 0x316   : > { %v1149_v24 = vpop.eup %927 }
 0x317   : > { %v627_v25 = vsel %vm306_vm1, %v1149_v24, 0.0  ;;  %v593_v28 = vpop.xlane.xlu0 %592 }
 0x318   : > { %628 = vadd.xlane.f32.xlu1 %v627_v25  ;;  %v605_v31 = vsub.f32 %v569_v47, %v593_v28 }
 0x31a   : > { %v1153_v26 = vpop.eup %929  ;;  %v618_v33 = vmul.f32 1.442695, %v605_v31 }
 0x31b   : > { %v636_v27 = vsel %vm306_vm1, %v1153_v26, 0.0 }
 0x320   : > { %637 = vadd.xlane.f32.xlu1 %v636_v27 }
 0x321   : > { %v584_v29 = vpop.xlane.xlu2 %583 }
 0x322   : > { %v602_v30 = vsub.f32 %v562_v52, %v584_v29 }
 0x324   : > { %v612_v32 = vmul.f32 1.442695, %v602_v30 }
 0x326   : > { %931 = vpow2.f32 %v612_v32 }
 0x327   : > { %933 = vpow2.f32 %v618_v33 }
 0x329   : > { %v599_v34 = vpop.xlane.xlu2 %598  ;;  %v587_v35 = vpop.xlane.xlu1 %586 }
 0x32a   : > { %v607_v36 = vsub.f32 %v574_v56, %v599_v34  ;;  %v603_v60 = vsub.f32 %v564_v58, %v587_v35 }
 0x32c   : > { %v1157_v50 = vpop.eup %931  ;;  %v622_v6 = vmul.f32 1.442695, %v607_v36  ;;  %v614_v37 = vmul.f32 1.442695, %v603_v60 }
 0x32d   : > { %v630_v5 = vsel %vm306_vm1, %v1157_v50, 0.0  ;;  %v1161_v38 = vpop.eup %933 }
 0x32e   : > { %935 = vpow2.f32 %v622_v6  ;;  %631 = vadd.xlane.f32.xlu2 %v630_v5  ;;  %v639_v8 = vsel %vm306_vm1, %v1161_v38, 0.0 }
 0x32f   : > { %937 = vpow2.f32 %v614_v37 }
 0x331   : > { %v596_v0 = vpop.xlane.xlu1 %595 }
 0x332   : > { %v606_v55 = vsub.f32 %v572_v62, %v596_v0 }
 0x334   : > { %v1163_v39 = vpop.eup %935  ;;  %v620_v40 = vmul.f32 1.442695, %v606_v55 }
 0x335   : > { %v1165_v7 = vpop.eup %937  ;;  %v645_v41 = vsel %vm306_vm1, %v1163_v39, 0.0 }
 0x336   : > { %939 = vpow2.f32 %v620_v40  ;;  %640 = vadd.xlane.f32.xlu2 %v639_v8  ;;  %646 = vadd.xlane.f32.xlu1 %v645_v41  ;;  %v633_v23 = vsel %vm306_vm1, %v1165_v7, 0.0 }
 0x337   : > { %634 = vadd.xlane.f32.xlu0 %v633_v23 }
 0x33c   : > { %v1173_v42 = vpop.eup %939 }
 0x33d   : > { %v642_v13 = vsel %vm306_vm1, %v1173_v42, 0.0 }
 0x33f   : > { %643 = vadd.xlane.f32.xlu0 %v642_v13 }
 0x383   : > { %v626_v14 = vpop.xlane.xlu0 %625 }
 0x384   : > { %941 = vrcp.f32 %v626_v14  ;;  %v659_v19 = vand.u32 2147483648, %v626_v14  ;;  %v657_v45 = vand.u32 2147483647, %v626_v14  ;;  %vm653_vm3 = vweird.f32 %v626_v14 }
 0x386   : > { %v660_v47 = vor.u32 1.1754944e-38, %v659_v19  ;;  %vm658_vm5 = vcmp.eq.f32.partialorder %v657_v45, 8.507059e+37 }
 0x38a   : > { %v942_v17 = vpop.eup %941 }
 0x38b   : > { %v649_v22 = vmul.f32 %v942_v17, %v626_v14  ;;  %v629_v43 = vpop.xlane.xlu1 %628  ;;  %vm654_vm2 = vweird.f32 %v942_v17 }
 0x38c   : > { %943 = vrcp.f32 %v629_v43  ;;  %vm655_vm4 = vmor %vm653_vm3, %vm654_vm2  ;;  %v673_v56 = vand.u32 2147483648, %v629_v43  ;;  %v671_v58 = vand.u32 2147483647, %v629_v43  ;;  %vm667_vm7 = vweird.f32 %v629_v43 }
 0x38d   : > { %v650_v44 = vsub.f32 1.0, %v649_v22 }
 0x38e   : > { %v674_v62 = vor.u32 1.1754944e-38, %v673_v56  ;;  %vm672_vm9 = vcmp.eq.f32.partialorder %v671_v58, 8.507059e+37 }
 0x38f   : > { %v651_v12 = vmul.f32 %v942_v17, %v650_v44 }
 0x391   : > { %v652_v11 = vadd.f32 %v942_v17, %v651_v12 }
 0x392   : > { %v944_v46 = vpop.eup %943 }
 0x393   : > { %v656_v48 = vsel %vm655_vm4, %v942_v17, %v652_v11  ;;  %v663_v49 = vmul.f32 %v944_v46, %v629_v43  ;;  %v638_v51 = vpop.xlane.xlu1 %637  ;;  %vm668_vm6 = vweird.f32 %v944_v46 }
 0x394   : > { %v661_v52 = vsel %vm658_vm5, %v660_v47, %v656_v48  ;;  %945 = vrcp.f32 %v638_v51  ;;  %vm669_vm8 = vmor %vm667_vm7, %vm668_vm6  ;;  %v715_v9 = vand.u32 2147483648, %v638_v51  ;;  %v713_v15 = vand.u32 2147483647, %v638_v51 }
 0x395   : > { %v760_v53 = vmul.f32 %v1145_v10, %v661_v52  ;;  %v664_v54 = vsub.f32 1.0, %v663_v49  ;;  %vm709_vm11 = vweird.f32 %v638_v51 }
 0x396   : > { %v716_v20 = vor.u32 1.1754944e-38, %v715_v9  ;;  %vm714_vm13 = vcmp.eq.f32.partialorder %v713_v15, 8.507059e+37 }
 0x397   : > { %768 = vst.msk [vmem:[%s1181_s22] sm:$0xff] %vm306_vm1, %v760_v53  ;;  %v665_v57 = vmul.f32 %v944_v46, %v664_v54 }
 0x399   : > { %v666_v59 = vadd.f32 %v944_v46, %v665_v57 }
 0x39a   : > { %v946_v61 = vpop.eup %945 }
 0x39b   : > { %v670_v63 = vsel %vm669_vm8, %v944_v46, %v666_v59  ;;  %v705_v1 = vmul.f32 %v946_v61, %v638_v51  ;;  %vm710_vm10 = vweird.f32 %v946_v61 }
 0x39c   : > { %v675_v2 = vsel %vm672_vm9, %v674_v62, %v670_v63  ;;  %vm711_vm12 = vmor %vm709_vm11, %vm710_vm10 }
 0x39d   : > { %v761_v3 = vmul.f32 %v1149_v24, %v675_v2  ;;  %v706_v4 = vsub.f32 1.0, %v705_v1 }
 0x39f   : > { %769 = vst.msk [vmem:[%s1181_s22 + $0x8] sm:$0xff] %vm306_vm1, %v761_v3  ;;  %v707_v10 = vmul.f32 %v946_v61, %v706_v4 }
 0x3a1   : > { %v708_v16 = vadd.f32 %v946_v61, %v707_v10  ;;  %v632_v18 = vpop.xlane.xlu2 %631 }
 0x3a2   : > { %947 = vrcp.f32 %v632_v18  ;;  %v687_v33 = vand.u32 2147483648, %v632_v18  ;;  %v685_v35 = vand.u32 2147483647, %v632_v18  ;;  %vm681_vm15 = vweird.f32 %v632_v18 }
 0x3a3   : > { %v712_v21 = vsel %vm711_vm12, %v946_v61, %v708_v16 }
 0x3a4   : > { %v717_v25 = vsel %vm714_vm13, %v716_v20, %v712_v21  ;;  %vm686_vm2 = vcmp.eq.f32.partialorder %v685_v35, 8.507059e+37 }
 0x3a5   : > { %v764_v27 = vmul.f32 %v1153_v26, %v717_v25  ;;  %v688_v26 = vor.u32 1.1754944e-38, %v687_v33 }
 0x3a7   : > { %772 = vst.msk [vmem:[%s1181_s22 + $0x20] sm:$0xff] %vm306_vm1, %v764_v27 }
 0x3a8   : > { %v948_v24 = vpop.eup %947 }
 0x3a9   : > { %v677_v28 = vmul.f32 %v948_v24, %v632_v18  ;;  %v641_v29 = vpop.xlane.xlu2 %640  ;;  %v647_v30 = vpop.xlane.xlu1 %646  ;;  %vm682_vm14 = vweird.f32 %v948_v24 }
 0x3aa   : > { %949 = vrcp.f32 %v641_v29  ;;  %v635_v31 = vpop.xlane.xlu0 %634  ;;  %vm683_vm0 = vmor %vm681_vm15, %vm682_vm14  ;;  %vm723_vm3 = vweird.f32 %v641_v29  ;;  %v727_v13 = vand.u32 2147483647, %v641_v29  ;;  %v729_v17 = vand.u32 2147483648, %v641_v29 }
 0x3ab   : > { %v678_v32 = vsub.f32 1.0, %v677_v28  ;;  %951 = vrcp.f32 %v635_v31  ;;  %v699_v43 = vand.u32 2147483647, %v635_v31  ;;  %v701_v19 = vand.u32 2147483648, %v635_v31 }
 0x3ac   : > { %953 = vrcp.f32 %v647_v30  ;;  %v755_v11 = vand.u32 2147483647, %v647_v30  ;;  %v757_v46 = vand.u32 2147483648, %v647_v30  ;;  %vm695_vm6 = vweird.f32 %v635_v31 }
 0x3ad   : > { %v679_v34 = vmul.f32 %v948_v24, %v678_v32  ;;  %vm728_vm9 = vcmp.eq.f32.partialorder %v727_v13, 8.507059e+37  ;;  %v730_v48 = vor.u32 1.1754944e-38, %v729_v17  ;;  %vm700_vm10 = vcmp.eq.f32.partialorder %v699_v43, 8.507059e+37 }
 0x3ae   : > { %v702_v52 = vor.u32 1.1754944e-38, %v701_v19  ;;  %vm751_vm12 = vweird.f32 %v647_v30  ;;  %vm756_vm14 = vcmp.eq.f32.partialorder %v755_v11, 8.507059e+37  ;;  %v758_v58 = vor.u32 1.1754944e-38, %v757_v46 }
 0x3af   : > { %v680_v36 = vadd.f32 %v948_v24, %v679_v34 }
 0x3b0   : > { %v950_v60 = vpop.eup %949 }
 0x3b1   : > { %v952_v6 = vpop.eup %951  ;;  %v684_v37 = vsel %vm683_vm0, %v948_v24, %v680_v36  ;;  %v719_v5 = vmul.f32 %v950_v60, %v641_v29  ;;  %vm724_vm4 = vweird.f32 %v950_v60 }
 0x3b2   : > { %v954_v0 = vpop.eup %953  ;;  %v689_v55 = vsel %vm686_vm2, %v688_v26, %v684_v37  ;;  %v691_v40 = vmul.f32 %v952_v6, %v635_v31  ;;  %v644_v8 = vpop.xlane.xlu0 %643  ;;  %vm696_vm5 = vweird.f32 %v952_v6  ;;  %vm725_vm8 = vmor %vm723_vm3, %vm724_vm4 }
 0x3b3   : > { %v762_v41 = vmul.f32 %v1157_v50, %v689_v55  ;;  %v720_v23 = vsub.f32 1.0, %v719_v5  ;;  %v747_v14 = vmul.f32 %v954_v0, %v647_v30  ;;  %955 = vrcp.f32 %v644_v8  ;;  %vm697_vm11 = vmor %vm695_vm6, %vm696_vm5 }
 0x3b4   : > { %v692_v22 = vsub.f32 1.0, %v691_v40  ;;  %vm752_vm7 = vweird.f32 %v954_v0  ;;  %v743_v9 = vand.u32 2147483648, %v644_v8  ;;  %vm737_vm0 = vweird.f32 %v644_v8 }
 0x3b5   : > { %770 = vst.msk [vmem:[%s1181_s22 + $0x10] sm:$0xff] %vm306_vm1, %v762_v41  ;;  %v721_v44 = vmul.f32 %v950_v60, %v720_v23  ;;  %v748_v12 = vsub.f32 1.0, %v747_v14  ;;  %vm753_vm13 = vmor %vm751_vm12, %vm752_vm7 }
 0x3b6   : > { %v693_v45 = vmul.f32 %v952_v6, %v692_v22  ;;  %v744_v16 = vor.u32 1.1754944e-38, %v743_v9 }
 0x3b7   : > { %v722_v47 = vadd.f32 %v950_v60, %v721_v44  ;;  %v749_v50 = vmul.f32 %v954_v0, %v748_v12 }
 0x3b8   : > { %v694_v49 = vadd.f32 %v952_v6, %v693_v45 }
 0x3b9   : > { %v726_v51 = vsel %vm725_vm8, %v950_v60, %v722_v47  ;;  %v750_v53 = vadd.f32 %v954_v0, %v749_v50  ;;  %v956_v54 = vpop.eup %955 }
 0x3ba   : > { %v731_v56 = vsel %vm728_vm9, %v730_v48, %v726_v51  ;;  %v698_v57 = vsel %vm697_vm11, %v952_v6, %v694_v49  ;;  %v733_v63 = vmul.f32 %v956_v54, %v644_v8  ;;  %vm738_vm15 = vweird.f32 %v956_v54 }
 0x3bb   : > { %v765_v59 = vmul.f32 %v1161_v38, %v731_v56  ;;  %v703_v61 = vsel %vm700_vm10, %v702_v52, %v698_v57  ;;  %v754_v62 = vsel %vm753_vm13, %v954_v0, %v750_v53  ;;  %v741_v38 = vand.u32 2147483647, %v644_v8  ;;  %vm739_vm2 = vmor %vm737_vm0, %vm738_vm15 }
 0x3bc   : > { %v763_v1 = vmul.f32 %v1165_v7, %v703_v61  ;;  %v759_v2 = vsel %vm756_vm14, %v758_v58, %v754_v62  ;;  %v734_v4 = vsub.f32 1.0, %v733_v63 }
 0x3bd   : > { %773 = vst.msk [vmem:[%s1181_s22 + $0x28] sm:$0xff] %vm306_vm1, %v765_v59  ;;  %v767_v3 = vmul.f32 %v1163_v39, %v759_v2  ;;  %vm742_vm3 = vcmp.eq.f32.partialorder %v741_v38, 8.507059e+37 }
 0x3be   : > { %771 = vst.msk [vmem:[%s1181_s22 + $0x18] sm:$0xff] %vm306_vm1, %v763_v1  ;;  %v735_v10 = vmul.f32 %v956_v54, %v734_v4 }
 0x3bf   : > { %775 = vst.msk [vmem:[%s1181_s22 + $0x38] sm:$0xff] %vm306_vm1, %v767_v3 }
 0x3c0   : > { %v736_v15 = vadd.f32 %v956_v54, %v735_v10 }
 0x3c2   : > { %v740_v7 = vsel %vm739_vm2, %v956_v54, %v736_v15 }
 0x3c3   : > { %v745_v18 = vsel %vm742_vm3, %v744_v16, %v740_v7 }
 0x3c4   : > { %v766_v20 = vmul.f32 %v1173_v42, %v745_v18 }
 0x3c6   : > { %774 = vst.msk [vmem:[%s1181_s22 + $0x30] sm:$0xff] %vm306_vm1, %v766_v20 }
 0x3c7 PF: > { %s16_s21 = sadd.s32 1, %s963_s21  }
 0x3c8   : > { %p13_p4 = scmp.ge.s32.totalorder %s16_s21, 10  }
 0x3ca   :  { %15 = sbr.rel (!%p13_p4) target bundleno = 1 (0x1), region = 77 }

</bundles_post_ra>
